<compile_context>
chip_gen: v5e
topology: v5e:2x2
jax: 0.10.0
libtpu: 0.0.40
codegen_flags: <defaults>
</compile_context>

<pallas_src>
import functools
import math

import jax
import jax.numpy as jnp
from jax.experimental import pallas as pl
from jax.experimental.pallas import tpu as pltpu


# --------------------------------------------------------------------------------------
# Fused whole-model Pallas kernel
# --------------------------------------------------------------------------------------

def _bert_fused_kernel(emb_ref, mask_ref, vec_ref, wqkv_ref, wo_ref, wi_ref, wf_ref,
                       pool_w_ref, cls_w_ref, out_ref, ctx_ref,
                       *, num_layers, num_heads, hidden, inter, eps=1e-12):
    H, I = hidden, inter
    dh = H // num_heads

    vecs = vec_ref[...]                                   # (NV, 128) f32 slab of all 1-row params

    def vrow(i, w):
        return vecs[i:i + 1, :w]                          # (1, w) static slice

    def layernorm(h, g, b):
        mean = jnp.mean(h, axis=-1, keepdims=True)
        cent = h - mean
        var = jnp.mean(cent * cent, axis=-1, keepdims=True)
        return cent * jax.lax.rsqrt(var + eps) * g + b

    def gelu(y):
        # BERT GELU (tanh approximation, i.e. HF "gelu_new"); f32 VPU/EUP math.
        return 0.5 * y * (1.0 + jnp.tanh(0.7978845608028654 * (y + 0.044715 * y * y * y)))

    def dot_bf16(a, b):
        # bf16 MXU operands, f32 accumulation.
        return jnp.dot(a.astype(jnp.bfloat16), b, preferred_element_type=jnp.float32)

    # --- embeddings LayerNorm ---
    x = layernorm(emb_ref[...], vrow(0, H), vrow(1, H))    # (M, H) f32
    mask = mask_ref[...]                                   # (M, M) additive bias, precomputed once

    for l in range(num_layers):                            # static unroll (tiny model)
        base = 2 + 8 * l
        bqkv = vrow(base + 0, 3 * H)
        bo = vrow(base + 1, H)
        ln1g = vrow(base + 2, H)
        ln1b = vrow(base + 3, H)
        bi = vrow(base + 4, I)
        bf_ = vrow(base + 5, H)
        ln2g = vrow(base + 6, H)
        ln2b = vrow(base + 7, H)

        # fused QKV projection (1/sqrt(dh) already folded into the Q columns + Q bias)
        qkv = dot_bf16(x, wqkv_ref[l]) + bqkv              # (M, 3H) f32
        q = qkv[:, :H].astype(jnp.bfloat16)
        k = qkv[:, H:2 * H].astype(jnp.bfloat16)
        v = qkv[:, 2 * H:].astype(jnp.bfloat16)

        # multi-head attention, fully 2-D: (M, M) scores per head, ctx written at lane offset
        for h in range(num_heads):
            sl = slice(h * dh, (h + 1) * dh)
            s = jax.lax.dot_general(q[:, sl], k[:, sl],
                                    (((1,), (1,)), ((), ())),
                                    preferred_element_type=jnp.float32) + mask     # (M, M) f32
            s = s - jnp.max(s, axis=-1, keepdims=True)
            p = jnp.exp(s)
            p = p / jnp.sum(p, axis=-1, keepdims=True)     # exact divide (PyTorch parity)
            ctx_ref[:, sl] = jnp.dot(p.astype(jnp.bfloat16), v[:, sl],
                                     preferred_element_type=jnp.float32)           # (M, dh)

        attn_out = dot_bf16(ctx_ref[...], wo_ref[l]) + bo
        x = layernorm(attn_out + x, ln1g, ln1b)

        ff = gelu(dot_bf16(x, wi_ref[l]) + bi)
        ff = dot_bf16(ff, wf_ref[l]) + bf_
        x = layernorm(ff + x, ln2g, ln2b)

    # Pooler + classifier + softmax for every token row (cheap at this size); the wrapper
    # selects the CLS rows — identical result since all three ops are row-wise.
    pooled = jnp.tanh(dot_bf16(x, pool_w_ref[...]) + vrow(2 + 8 * num_layers, H))
    # 128-wide lane-dense logits; padded label columns carry a -1e9 bias so exp() -> 0.
    logits = dot_bf16(pooled, cls_w_ref[...]) + vrow(2 + 8 * num_layers + 1, 128)   # (M, 128)
    logits = logits - jnp.max(logits, axis=-1, keepdims=True)
    e = jnp.exp(logits)
    out_ref[...] = e / jnp.sum(e, axis=-1, keepdims=True)


# --------------------------------------------------------------------------------------
# Deterministic parameter init (small BERT-like config)
# --------------------------------------------------------------------------------------

CFG = dict(
    vocab=64,
    max_pos=16,
    type_vocab=2,
    hidden=32,
    heads=2,
    layers=2,
    intermediate=64,
    num_labels=3,
)


def _normal(key, shape, std=0.02):
    return std * jax.random.normal(key, shape, dtype=jnp.float32)


def init_params(key, cfg):
    H, I, L = cfg["hidden"], cfg["intermediate"], cfg["num_labels"]
    keys = iter(jax.random.split(key, 8 + 12 * cfg["layers"]))
    params = dict(
        word_emb=_normal(next(keys), (cfg["vocab"], H)),
        pos_emb=_normal(next(keys), (cfg["max_pos"], H)),
        type_emb=_normal(next(keys), (cfg["type_vocab"], H)),
        emb_ln_g=jnp.ones((H,), jnp.float32),
        emb_ln_b=jnp.zeros((H,), jnp.float32),
        pool_w=_normal(next(keys), (H, H)),
        pool_b=jnp.zeros((H,), jnp.float32),
        cls_w=_normal(next(keys), (H, L)),
        cls_b=jnp.zeros((L,), jnp.float32),
        layers=[],
    )
    for _ in range(cfg["layers"]):
        params["layers"].append(dict(
            wq=_normal(next(keys), (H, H)), bq=jnp.zeros((H,), jnp.float32),
            wk=_normal(next(keys), (H, H)), bk=jnp.zeros((H,), jnp.float32),
            wv=_normal(next(keys), (H, H)), bv=jnp.zeros((H,), jnp.float32),
            wo=_normal(next(keys), (H, H)), bo=jnp.zeros((H,), jnp.float32),
            ln1_g=jnp.ones((H,), jnp.float32), ln1_b=jnp.zeros((H,), jnp.float32),
            wi=_normal(next(keys), (H, I)), bi=jnp.zeros((I,), jnp.float32),
            wf=_normal(next(keys), (I, H)), bf=jnp.zeros((H,), jnp.float32),
            ln2_g=jnp.ones((H,), jnp.float32), ln2_b=jnp.zeros((H,), jnp.float32),
        ))
    return params


# --------------------------------------------------------------------------------------
# Forward pass:  Pretrain_bert.forward(input_ids, attention_mask, token_type_ids)
# --------------------------------------------------------------------------------------

def pretrain_bert_forward(params, input_ids, attention_mask, token_type_ids, cfg=CFG):
    B, S = input_ids.shape
    H, nh = cfg["hidden"], cfg["heads"]
    I, L = cfg["intermediate"], cfg["num_labels"]
    M = B * S
    dh = H // nh
    scale = 1.0 / math.sqrt(dh)
    VW = 128  # lane-dense vector-slab / classifier width

    # --- embeddings (gather is glue); LayerNorm runs inside the fused kernel ---
    emb = (params["word_emb"][input_ids]
           + params["pos_emb"][:S][None, :, :]
           + params["type_emb"][token_type_ids]).reshape(M, H).astype(jnp.float32)

    # --- (M, M) additive mask: block-diagonal batch structure + key attention mask ---
    batch_idx = jnp.repeat(jnp.arange(B), S)                                    # (M,)
    key_ok = attention_mask.reshape(M) > 0
    allowed = (batch_idx[:, None] == batch_idx[None, :]) & key_ok[None, :]
    mask_mm = jnp.where(allowed, 0.0, -1e9).astype(jnp.float32)                 # (M, M)

    # --- pack every 1-row parameter into one (NV, 128) f32 slab (single DMA) ---
    def pad_vec(v, fill=0.0):
        row = jnp.full((1, VW), fill, jnp.float32)
        return row.at[0, :v.shape[0]].set(v.astype(jnp.float32))

    vec_rows = [pad_vec(params["emb_ln_g"]), pad_vec(params["emb_ln_b"])]
    wqkv_l, wo_l, wi_l, wf_l = [], [], [], []
    for layer in params["layers"]:
        # fold the 1/sqrt(dh) attention scale into the Q projection (weights AND bias)
        wqkv = jnp.concatenate([layer["wq"] * scale, layer["wk"], layer["wv"]], axis=1)  # (H, 3H)
        bqkv = jnp.concatenate([layer["bq"] * scale, layer["bk"], layer["bv"]])          # (3H,)
        wqkv_l.append(wqkv)
        wo_l.append(layer["wo"])
        wi_l.append(layer["wi"])
        wf_l.append(layer["wf"])
        vec_rows += [pad_vec(bqkv), pad_vec(layer["bo"]),
                     pad_vec(layer["ln1_g"]), pad_vec(layer["ln1_b"]),
                     pad_vec(layer["bi"]), pad_vec(layer["bf"]),
                     pad_vec(layer["ln2_g"]), pad_vec(layer["ln2_b"])]
    vec_rows += [pad_vec(params["pool_b"]),
                 pad_vec(params["cls_b"], fill=-1e9)]       # padded logit cols -> -1e9 bias
    vec_slab = jnp.concatenate(vec_rows, axis=0)            # (NV, 128) f32

    # --- stacked bf16 weight slabs (one DMA each) ---
    wqkv_s = jnp.stack(wqkv_l).astype(jnp.bfloat16)         # (Ly, H, 3H)
    wo_s = jnp.stack(wo_l).astype(jnp.bfloat16)             # (Ly, H, H)
    wi_s = jnp.stack(wi_l).astype(jnp.bfloat16)             # (Ly, H, I)
    wf_s = jnp.stack(wf_l).astype(jnp.bfloat16)             # (Ly, I, H)
    pool_w = params["pool_w"].astype(jnp.bfloat16)          # (H, H)
    cls_w = (jnp.zeros((H, VW), jnp.float32)
             .at[:, :L].set(params["cls_w"])).astype(jnp.bfloat16)              # (H, 128)

    # Single pallas_call: no grid -> one invocation, every operand fully VMEM-resident.
    probs_all = pl.pallas_call(
        functools.partial(_bert_fused_kernel, num_layers=cfg["layers"], num_heads=nh,
                          hidden=H, inter=I),
        out_shape=jax.ShapeDtypeStruct((M, VW), jnp.float32),
        scratch_shapes=[pltpu.VMEM((M, H), jnp.float32)],    # per-layer attention context
    )(emb, mask_mm, vec_slab, wqkv_s, wo_s, wi_s, wf_s, pool_w, cls_w)

    # nn.Softmax(dim=1)(classifier(pooler(CLS))): select the CLS-token row per batch item
    # and the real (unpadded) label columns.
    return probs_all.reshape(B, S, VW)[:, 0, :L]


# --------------------------------------------------------------------------------------

if __name__ == "__main__":
    key = jax.random.PRNGKey(0)
    k_param, k_ids, _ = jax.random.split(key, 3)

    B, S = 2, 8
    params = init_params(k_param, CFG)

    input_ids = jax.random.randint(k_ids, (B, S), 0, CFG["vocab"], dtype=jnp.int32)
    attention_mask = jnp.array([[1, 1, 1, 1, 1, 1, 1, 1],
                                [1, 1, 1, 1, 1, 0, 0, 0]], dtype=jnp.int32)
    token_type_ids = jnp.array([[0, 0, 0, 0, 1, 1, 1, 1],
                                [0, 0, 0, 1, 1, 0, 0, 0]], dtype=jnp.int32)

    probs = pretrain_bert_forward(params, input_ids, attention_mask, token_type_ids)
    probs = jax.block_until_ready(probs)

    assert probs.shape == (B, CFG["num_labels"])
    assert bool(jnp.all(jnp.abs(jnp.sum(probs, axis=1) - 1.0) < 1e-4))
    print("KERNEL_OK")
</pallas_src>

<mosaic_0001>
module attributes {stable_mosaic.version = 11 : i64} {
  func.func @_bert_fused_kernel(%arg0: memref<16x32xf32, #tpu.memory_space<vmem>>, %arg1: memref<16x16xf32, #tpu.memory_space<vmem>>, %arg2: memref<20x128xf32, #tpu.memory_space<vmem>>, %arg3: memref<2x32x96xbf16, #tpu.memory_space<vmem>>, %arg4: memref<2x32x32xbf16, #tpu.memory_space<vmem>>, %arg5: memref<2x32x64xbf16, #tpu.memory_space<vmem>>, %arg6: memref<2x64x32xbf16, #tpu.memory_space<vmem>>, %arg7: memref<32x32xbf16, #tpu.memory_space<vmem>>, %arg8: memref<32x128xbf16, #tpu.memory_space<vmem>>, %arg9: memref<16x128xf32, #tpu.memory_space<vmem>>, %arg10: memref<16x32xf32, #tpu.memory_space<vmem>>) attributes {dimension_semantics = [], scalar_prefetch = 0 : i64, scratch_operands = 1 : i64, tpu.core_type = #tpu.core_type<tc>} {
    %c0 = arith.constant 0 : index
    %c0_0 = arith.constant 0 : index
    %0 = vector.load %arg2[%c0, %c0_0] : memref<20x128xf32, #tpu.memory_space<vmem>>, vector<20x128xf32>
    %c0_1 = arith.constant 0 : index
    %c0_2 = arith.constant 0 : index
    %1 = vector.load %arg0[%c0_1, %c0_2] : memref<16x32xf32, #tpu.memory_space<vmem>>, vector<16x32xf32>
    %2 = vector.extract_strided_slice %0 {offsets = [0, 0], sizes = [1, 32], strides = [1, 1]} : vector<20x128xf32> to vector<1x32xf32>
    %3 = vector.extract_strided_slice %0 {offsets = [1, 0], sizes = [1, 32], strides = [1, 1]} : vector<20x128xf32> to vector<1x32xf32>
    %cst = arith.constant dense<0.000000e+00> : vector<16xf32>
    %4 = vector.multi_reduction <add>, %1, %cst [1] : vector<16x32xf32> to vector<16xf32>
    %5 = vector.shape_cast %4 : vector<16xf32> to vector<16x1xf32>
    %cst_3 = arith.constant 3.200000e+01 : f32
    %6 = vector.broadcast %cst_3 : f32 to vector<16x1xf32>
    %7 = arith.divf %5, %6 : vector<16x1xf32>
    %8 = vector.broadcast %7 : vector<16x1xf32> to vector<16x32xf32>
    %9 = arith.subf %1, %8 : vector<16x32xf32>
    %10 = arith.mulf %9, %9 : vector<16x32xf32>
    %cst_4 = arith.constant dense<0.000000e+00> : vector<16xf32>
    %11 = vector.multi_reduction <add>, %10, %cst_4 [1] : vector<16x32xf32> to vector<16xf32>
    %12 = vector.shape_cast %11 : vector<16xf32> to vector<16x1xf32>
    %cst_5 = arith.constant 3.200000e+01 : f32
    %13 = vector.broadcast %cst_5 : f32 to vector<16x1xf32>
    %14 = arith.divf %12, %13 : vector<16x1xf32>
    %cst_6 = arith.constant 9.99999996E-13 : f32
    %15 = vector.broadcast %cst_6 : f32 to vector<16x1xf32>
    %16 = arith.addf %14, %15 : vector<16x1xf32>
    %17 = math.rsqrt %16 : vector<16x1xf32>
    %18 = vector.broadcast %17 : vector<16x1xf32> to vector<16x32xf32>
    %19 = arith.mulf %9, %18 : vector<16x32xf32>
    %20 = vector.broadcast %2 : vector<1x32xf32> to vector<16x32xf32>
    %21 = arith.mulf %19, %20 : vector<16x32xf32>
    %22 = vector.broadcast %3 : vector<1x32xf32> to vector<16x32xf32>
    %23 = arith.addf %21, %22 : vector<16x32xf32>
    %c0_7 = arith.constant 0 : index
    %c0_8 = arith.constant 0 : index
    %24 = vector.load %arg1[%c0_7, %c0_8] : memref<16x16xf32, #tpu.memory_space<vmem>>, vector<16x16xf32>
    %25 = vector.extract_strided_slice %0 {offsets = [2, 0], sizes = [1, 96], strides = [1, 1]} : vector<20x128xf32> to vector<1x96xf32>
    %26 = vector.extract_strided_slice %0 {offsets = [3, 0], sizes = [1, 32], strides = [1, 1]} : vector<20x128xf32> to vector<1x32xf32>
    %27 = vector.extract_strided_slice %0 {offsets = [4, 0], sizes = [1, 32], strides = [1, 1]} : vector<20x128xf32> to vector<1x32xf32>
    %28 = vector.extract_strided_slice %0 {offsets = [5, 0], sizes = [1, 32], strides = [1, 1]} : vector<20x128xf32> to vector<1x32xf32>
    %29 = vector.extract_strided_slice %0 {offsets = [6, 0], sizes = [1, 64], strides = [1, 1]} : vector<20x128xf32> to vector<1x64xf32>
    %30 = vector.extract_strided_slice %0 {offsets = [7, 0], sizes = [1, 32], strides = [1, 1]} : vector<20x128xf32> to vector<1x32xf32>
    %31 = vector.extract_strided_slice %0 {offsets = [8, 0], sizes = [1, 32], strides = [1, 1]} : vector<20x128xf32> to vector<1x32xf32>
    %32 = vector.extract_strided_slice %0 {offsets = [9, 0], sizes = [1, 32], strides = [1, 1]} : vector<20x128xf32> to vector<1x32xf32>
    %c0_9 = arith.constant 0 : index
    %c0_10 = arith.constant 0 : index
    %c0_11 = arith.constant 0 : index
    %33 = vector.load %arg3[%c0_9, %c0_10, %c0_11] : memref<2x32x96xbf16, #tpu.memory_space<vmem>>, vector<1x32x96xbf16>
    %34 = vector.shape_cast %33 : vector<1x32x96xbf16> to vector<32x96xbf16>
    %35 = arith.truncf %23 : vector<16x32xf32> to vector<16x32xbf16>
    %cst_12 = arith.constant dense<0.000000e+00> : vector<16x96xf32>
    %36 = tpu.matmul %35, %34, %cst_12 {dimension_numbers = #tpu.dot_dimension_numbers<[1], [0], [0], [1], [0, 0, 1, 1], [], []>} : vector<16x32xbf16>, vector<32x96xbf16>, vector<16x96xf32> -> vector<16x96xf32>
    %37 = vector.broadcast %25 : vector<1x96xf32> to vector<16x96xf32>
    %38 = arith.addf %36, %37 : vector<16x96xf32>
    %39 = vector.extract_strided_slice %38 {offsets = [0, 0], sizes = [16, 32], strides = [1, 1]} : vector<16x96xf32> to vector<16x32xf32>
    %40 = arith.truncf %39 : vector<16x32xf32> to vector<16x32xbf16>
    %41 = vector.extract_strided_slice %38 {offsets = [0, 32], sizes = [16, 32], strides = [1, 1]} : vector<16x96xf32> to vector<16x32xf32>
    %42 = arith.truncf %41 : vector<16x32xf32> to vector<16x32xbf16>
    %43 = vector.extract_strided_slice %38 {offsets = [0, 64], sizes = [16, 32], strides = [1, 1]} : vector<16x96xf32> to vector<16x32xf32>
    %44 = arith.truncf %43 : vector<16x32xf32> to vector<16x32xbf16>
    %45 = vector.extract_strided_slice %40 {offsets = [0, 0], sizes = [16, 16], strides = [1, 1]} : vector<16x32xbf16> to vector<16x16xbf16>
    %46 = vector.extract_strided_slice %42 {offsets = [0, 0], sizes = [16, 16], strides = [1, 1]} : vector<16x32xbf16> to vector<16x16xbf16>
    %cst_13 = arith.constant dense<0.000000e+00> : vector<16x16xf32>
    %47 = tpu.matmul %45, %46, %cst_13 {dimension_numbers = #tpu.dot_dimension_numbers<[1], [1], [0], [0], [0, 0, 1, 0], [], []>} : vector<16x16xbf16>, vector<16x16xbf16>, vector<16x16xf32> -> vector<16x16xf32>
    %48 = arith.addf %47, %24 : vector<16x16xf32>
    %cst_14 = arith.constant dense<0xFF800000> : vector<16xf32>
    %49 = vector.multi_reduction <maximumf>, %48, %cst_14 [1] : vector<16x16xf32> to vector<16xf32>
    %50 = vector.shape_cast %49 : vector<16xf32> to vector<16x1xf32>
    %51 = vector.broadcast %50 : vector<16x1xf32> to vector<16x16xf32>
    %52 = arith.subf %48, %51 : vector<16x16xf32>
    %53 = math.exp %52 : vector<16x16xf32>
    %cst_15 = arith.constant dense<0.000000e+00> : vector<16xf32>
    %54 = vector.multi_reduction <add>, %53, %cst_15 [1] : vector<16x16xf32> to vector<16xf32>
    %55 = vector.shape_cast %54 : vector<16xf32> to vector<16x1xf32>
    %56 = vector.broadcast %55 : vector<16x1xf32> to vector<16x16xf32>
    %57 = arith.divf %53, %56 : vector<16x16xf32>
    %58 = arith.truncf %57 : vector<16x16xf32> to vector<16x16xbf16>
    %59 = vector.extract_strided_slice %44 {offsets = [0, 0], sizes = [16, 16], strides = [1, 1]} : vector<16x32xbf16> to vector<16x16xbf16>
    %cst_16 = arith.constant dense<0.000000e+00> : vector<16x16xf32>
    %60 = tpu.matmul %58, %59, %cst_16 {dimension_numbers = #tpu.dot_dimension_numbers<[1], [0], [0], [1], [0, 0, 1, 1], [], []>} : vector<16x16xbf16>, vector<16x16xbf16>, vector<16x16xf32> -> vector<16x16xf32>
    %c0_17 = arith.constant 0 : index
    %c0_18 = arith.constant 0 : index
    %61 = vector.load %arg10[%c0_17, %c0_18] : memref<16x32xf32, #tpu.memory_space<vmem>>, vector<16x16xf32>
    tpu.vector_store %arg10[%c0_17, %c0_18], %60 {strides = array<i32>} : memref<16x32xf32, #tpu.memory_space<vmem>>, vector<16x16xf32>,
    %62 = vector.extract_strided_slice %40 {offsets = [0, 16], sizes = [16, 16], strides = [1, 1]} : vector<16x32xbf16> to vector<16x16xbf16>
    %63 = vector.extract_strided_slice %42 {offsets = [0, 16], sizes = [16, 16], strides = [1, 1]} : vector<16x32xbf16> to vector<16x16xbf16>
    %cst_19 = arith.constant dense<0.000000e+00> : vector<16x16xf32>
    %64 = tpu.matmul %62, %63, %cst_19 {dimension_numbers = #tpu.dot_dimension_numbers<[1], [1], [0], [0], [0, 0, 1, 0], [], []>} : vector<16x16xbf16>, vector<16x16xbf16>, vector<16x16xf32> -> vector<16x16xf32>
    %65 = arith.addf %64, %24 : vector<16x16xf32>
    %cst_20 = arith.constant dense<0xFF800000> : vector<16xf32>
    %66 = vector.multi_reduction <maximumf>, %65, %cst_20 [1] : vector<16x16xf32> to vector<16xf32>
    %67 = vector.shape_cast %66 : vector<16xf32> to vector<16x1xf32>
    %68 = vector.broadcast %67 : vector<16x1xf32> to vector<16x16xf32>
    %69 = arith.subf %65, %68 : vector<16x16xf32>
    %70 = math.exp %69 : vector<16x16xf32>
    %cst_21 = arith.constant dense<0.000000e+00> : vector<16xf32>
    %71 = vector.multi_reduction <add>, %70, %cst_21 [1] : vector<16x16xf32> to vector<16xf32>
    %72 = vector.shape_cast %71 : vector<16xf32> to vector<16x1xf32>
    %73 = vector.broadcast %72 : vector<16x1xf32> to vector<16x16xf32>
    %74 = arith.divf %70, %73 : vector<16x16xf32>
    %75 = arith.truncf %74 : vector<16x16xf32> to vector<16x16xbf16>
    %76 = vector.extract_strided_slice %44 {offsets = [0, 16], sizes = [16, 16], strides = [1, 1]} : vector<16x32xbf16> to vector<16x16xbf16>
    %cst_22 = arith.constant dense<0.000000e+00> : vector<16x16xf32>
    %77 = tpu.matmul %75, %76, %cst_22 {dimension_numbers = #tpu.dot_dimension_numbers<[1], [0], [0], [1], [0, 0, 1, 1], [], []>} : vector<16x16xbf16>, vector<16x16xbf16>, vector<16x16xf32> -> vector<16x16xf32>
    %c0_23 = arith.constant 0 : index
    %c16 = arith.constant 16 : index
    %78 = vector.load %arg10[%c0_23, %c16] : memref<16x32xf32, #tpu.memory_space<vmem>>, vector<16x16xf32>
    tpu.vector_store %arg10[%c0_23, %c16], %77 {strides = array<i32>} : memref<16x32xf32, #tpu.memory_space<vmem>>, vector<16x16xf32>,
    %c0_24 = arith.constant 0 : index
    %c0_25 = arith.constant 0 : index
    %79 = vector.load %arg10[%c0_24, %c0_25] : memref<16x32xf32, #tpu.memory_space<vmem>>, vector<16x32xf32>
    %c0_26 = arith.constant 0 : index
    %c0_27 = arith.constant 0 : index
    %c0_28 = arith.constant 0 : index
    %80 = vector.load %arg4[%c0_26, %c0_27, %c0_28] : memref<2x32x32xbf16, #tpu.memory_space<vmem>>, vector<1x32x32xbf16>
    %81 = vector.shape_cast %80 : vector<1x32x32xbf16> to vector<32x32xbf16>
    %82 = arith.truncf %79 : vector<16x32xf32> to vector<16x32xbf16>
    %cst_29 = arith.constant dense<0.000000e+00> : vector<16x32xf32>
    %83 = tpu.matmul %82, %81, %cst_29 {dimension_numbers = #tpu.dot_dimension_numbers<[1], [0], [0], [1], [0, 0, 1, 1], [], []>} : vector<16x32xbf16>, vector<32x32xbf16>, vector<16x32xf32> -> vector<16x32xf32>
    %84 = vector.broadcast %26 : vector<1x32xf32> to vector<16x32xf32>
    %85 = arith.addf %83, %84 : vector<16x32xf32>
    %86 = arith.addf %85, %23 : vector<16x32xf32>
    %cst_30 = arith.constant dense<0.000000e+00> : vector<16xf32>
    %87 = vector.multi_reduction <add>, %86, %cst_30 [1] : vector<16x32xf32> to vector<16xf32>
    %88 = vector.shape_cast %87 : vector<16xf32> to vector<16x1xf32>
    %cst_31 = arith.constant 3.200000e+01 : f32
    %89 = vector.broadcast %cst_31 : f32 to vector<16x1xf32>
    %90 = arith.divf %88, %89 : vector<16x1xf32>
    %91 = vector.broadcast %90 : vector<16x1xf32> to vector<16x32xf32>
    %92 = arith.subf %86, %91 : vector<16x32xf32>
    %93 = arith.mulf %92, %92 : vector<16x32xf32>
    %cst_32 = arith.constant dense<0.000000e+00> : vector<16xf32>
    %94 = vector.multi_reduction <add>, %93, %cst_32 [1] : vector<16x32xf32> to vector<16xf32>
    %95 = vector.shape_cast %94 : vector<16xf32> to vector<16x1xf32>
    %cst_33 = arith.constant 3.200000e+01 : f32
    %96 = vector.broadcast %cst_33 : f32 to vector<16x1xf32>
    %97 = arith.divf %95, %96 : vector<16x1xf32>
    %cst_34 = arith.constant 9.99999996E-13 : f32
    %98 = vector.broadcast %cst_34 : f32 to vector<16x1xf32>
    %99 = arith.addf %97, %98 : vector<16x1xf32>
    %100 = math.rsqrt %99 : vector<16x1xf32>
    %101 = vector.broadcast %100 : vector<16x1xf32> to vector<16x32xf32>
    %102 = arith.mulf %92, %101 : vector<16x32xf32>
    %103 = vector.broadcast %27 : vector<1x32xf32> to vector<16x32xf32>
    %104 = arith.mulf %102, %103 : vector<16x32xf32>
    %105 = vector.broadcast %28 : vector<1x32xf32> to vector<16x32xf32>
    %106 = arith.addf %104, %105 : vector<16x32xf32>
    %c0_35 = arith.constant 0 : index
    %c0_36 = arith.constant 0 : index
    %c0_37 = arith.constant 0 : index
    %107 = vector.load %arg5[%c0_35, %c0_36, %c0_37] : memref<2x32x64xbf16, #tpu.memory_space<vmem>>, vector<1x32x64xbf16>
    %108 = vector.shape_cast %107 : vector<1x32x64xbf16> to vector<32x64xbf16>
    %109 = arith.truncf %106 : vector<16x32xf32> to vector<16x32xbf16>
    %cst_38 = arith.constant dense<0.000000e+00> : vector<16x64xf32>
    %110 = tpu.matmul %109, %108, %cst_38 {dimension_numbers = #tpu.dot_dimension_numbers<[1], [0], [0], [1], [0, 0, 1, 1], [], []>} : vector<16x32xbf16>, vector<32x64xbf16>, vector<16x64xf32> -> vector<16x64xf32>
    %111 = vector.broadcast %29 : vector<1x64xf32> to vector<16x64xf32>
    %112 = arith.addf %110, %111 : vector<16x64xf32>
    %cst_39 = arith.constant 5.000000e-01 : f32
    %113 = vector.broadcast %cst_39 : f32 to vector<16x64xf32>
    %114 = arith.mulf %113, %112 : vector<16x64xf32>
    %cst_40 = arith.constant 4.471500e-02 : f32
    %115 = vector.broadcast %cst_40 : f32 to vector<16x64xf32>
    %116 = arith.mulf %115, %112 : vector<16x64xf32>
    %117 = arith.mulf %116, %112 : vector<16x64xf32>
    %118 = arith.mulf %117, %112 : vector<16x64xf32>
    %119 = arith.addf %112, %118 : vector<16x64xf32>
    %cst_41 = arith.constant 0.797884583 : f32
    %120 = vector.broadcast %cst_41 : f32 to vector<16x64xf32>
    %121 = arith.mulf %120, %119 : vector<16x64xf32>
    %122 = math.tanh %121 : vector<16x64xf32>
    %cst_42 = arith.constant 1.000000e+00 : f32
    %123 = vector.broadcast %cst_42 : f32 to vector<16x64xf32>
    %124 = arith.addf %123, %122 : vector<16x64xf32>
    %125 = arith.mulf %114, %124 : vector<16x64xf32>
    %c0_43 = arith.constant 0 : index
    %c0_44 = arith.constant 0 : index
    %c0_45 = arith.constant 0 : index
    %126 = vector.load %arg6[%c0_43, %c0_44, %c0_45] : memref<2x64x32xbf16, #tpu.memory_space<vmem>>, vector<1x64x32xbf16>
    %127 = vector.shape_cast %126 : vector<1x64x32xbf16> to vector<64x32xbf16>
    %128 = arith.truncf %125 : vector<16x64xf32> to vector<16x64xbf16>
    %cst_46 = arith.constant dense<0.000000e+00> : vector<16x32xf32>
    %129 = tpu.matmul %128, %127, %cst_46 {dimension_numbers = #tpu.dot_dimension_numbers<[1], [0], [0], [1], [0, 0, 1, 1], [], []>} : vector<16x64xbf16>, vector<64x32xbf16>, vector<16x32xf32> -> vector<16x32xf32>
    %130 = vector.broadcast %30 : vector<1x32xf32> to vector<16x32xf32>
    %131 = arith.addf %129, %130 : vector<16x32xf32>
    %132 = arith.addf %131, %106 : vector<16x32xf32>
    %cst_47 = arith.constant dense<0.000000e+00> : vector<16xf32>
    %133 = vector.multi_reduction <add>, %132, %cst_47 [1] : vector<16x32xf32> to vector<16xf32>
    %134 = vector.shape_cast %133 : vector<16xf32> to vector<16x1xf32>
    %cst_48 = arith.constant 3.200000e+01 : f32
    %135 = vector.broadcast %cst_48 : f32 to vector<16x1xf32>
    %136 = arith.divf %134, %135 : vector<16x1xf32>
    %137 = vector.broadcast %136 : vector<16x1xf32> to vector<16x32xf32>
    %138 = arith.subf %132, %137 : vector<16x32xf32>
    %139 = arith.mulf %138, %138 : vector<16x32xf32>
    %cst_49 = arith.constant dense<0.000000e+00> : vector<16xf32>
    %140 = vector.multi_reduction <add>, %139, %cst_49 [1] : vector<16x32xf32> to vector<16xf32>
    %141 = vector.shape_cast %140 : vector<16xf32> to vector<16x1xf32>
    %cst_50 = arith.constant 3.200000e+01 : f32
    %142 = vector.broadcast %cst_50 : f32 to vector<16x1xf32>
    %143 = arith.divf %141, %142 : vector<16x1xf32>
    %cst_51 = arith.constant 9.99999996E-13 : f32
    %144 = vector.broadcast %cst_51 : f32 to vector<16x1xf32>
    %145 = arith.addf %143, %144 : vector<16x1xf32>
    %146 = math.rsqrt %145 : vector<16x1xf32>
    %147 = vector.broadcast %146 : vector<16x1xf32> to vector<16x32xf32>
    %148 = arith.mulf %138, %147 : vector<16x32xf32>
    %149 = vector.broadcast %31 : vector<1x32xf32> to vector<16x32xf32>
    %150 = arith.mulf %148, %149 : vector<16x32xf32>
    %151 = vector.broadcast %32 : vector<1x32xf32> to vector<16x32xf32>
    %152 = arith.addf %150, %151 : vector<16x32xf32>
    %153 = vector.extract_strided_slice %0 {offsets = [10, 0], sizes = [1, 96], strides = [1, 1]} : vector<20x128xf32> to vector<1x96xf32>
    %154 = vector.extract_strided_slice %0 {offsets = [11, 0], sizes = [1, 32], strides = [1, 1]} : vector<20x128xf32> to vector<1x32xf32>
    %155 = vector.extract_strided_slice %0 {offsets = [12, 0], sizes = [1, 32], strides = [1, 1]} : vector<20x128xf32> to vector<1x32xf32>
    %156 = vector.extract_strided_slice %0 {offsets = [13, 0], sizes = [1, 32], strides = [1, 1]} : vector<20x128xf32> to vector<1x32xf32>
    %157 = vector.extract_strided_slice %0 {offsets = [14, 0], sizes = [1, 64], strides = [1, 1]} : vector<20x128xf32> to vector<1x64xf32>
    %158 = vector.extract_strided_slice %0 {offsets = [15, 0], sizes = [1, 32], strides = [1, 1]} : vector<20x128xf32> to vector<1x32xf32>
    %159 = vector.extract_strided_slice %0 {offsets = [16, 0], sizes = [1, 32], strides = [1, 1]} : vector<20x128xf32> to vector<1x32xf32>
    %160 = vector.extract_strided_slice %0 {offsets = [17, 0], sizes = [1, 32], strides = [1, 1]} : vector<20x128xf32> to vector<1x32xf32>
    %c1 = arith.constant 1 : index
    %c0_52 = arith.constant 0 : index
    %c0_53 = arith.constant 0 : index
    %161 = vector.load %arg3[%c1, %c0_52, %c0_53] : memref<2x32x96xbf16, #tpu.memory_space<vmem>>, vector<1x32x96xbf16>
    %162 = vector.shape_cast %161 : vector<1x32x96xbf16> to vector<32x96xbf16>
    %163 = arith.truncf %152 : vector<16x32xf32> to vector<16x32xbf16>
    %cst_54 = arith.constant dense<0.000000e+00> : vector<16x96xf32>
    %164 = tpu.matmul %163, %162, %cst_54 {dimension_numbers = #tpu.dot_dimension_numbers<[1], [0], [0], [1], [0, 0, 1, 1], [], []>} : vector<16x32xbf16>, vector<32x96xbf16>, vector<16x96xf32> -> vector<16x96xf32>
    %165 = vector.broadcast %153 : vector<1x96xf32> to vector<16x96xf32>
    %166 = arith.addf %164, %165 : vector<16x96xf32>
    %167 = vector.extract_strided_slice %166 {offsets = [0, 0], sizes = [16, 32], strides = [1, 1]} : vector<16x96xf32> to vector<16x32xf32>
    %168 = arith.truncf %167 : vector<16x32xf32> to vector<16x32xbf16>
    %169 = vector.extract_strided_slice %166 {offsets = [0, 32], sizes = [16, 32], strides = [1, 1]} : vector<16x96xf32> to vector<16x32xf32>
    %170 = arith.truncf %169 : vector<16x32xf32> to vector<16x32xbf16>
    %171 = vector.extract_strided_slice %166 {offsets = [0, 64], sizes = [16, 32], strides = [1, 1]} : vector<16x96xf32> to vector<16x32xf32>
    %172 = arith.truncf %171 : vector<16x32xf32> to vector<16x32xbf16>
    %173 = vector.extract_strided_slice %168 {offsets = [0, 0], sizes = [16, 16], strides = [1, 1]} : vector<16x32xbf16> to vector<16x16xbf16>
    %174 = vector.extract_strided_slice %170 {offsets = [0, 0], sizes = [16, 16], strides = [1, 1]} : vector<16x32xbf16> to vector<16x16xbf16>
    %cst_55 = arith.constant dense<0.000000e+00> : vector<16x16xf32>
    %175 = tpu.matmul %173, %174, %cst_55 {dimension_numbers = #tpu.dot_dimension_numbers<[1], [1], [0], [0], [0, 0, 1, 0], [], []>} : vector<16x16xbf16>, vector<16x16xbf16>, vector<16x16xf32> -> vector<16x16xf32>
    %176 = arith.addf %175, %24 : vector<16x16xf32>
    %cst_56 = arith.constant dense<0xFF800000> : vector<16xf32>
    %177 = vector.multi_reduction <maximumf>, %176, %cst_56 [1] : vector<16x16xf32> to vector<16xf32>
    %178 = vector.shape_cast %177 : vector<16xf32> to vector<16x1xf32>
    %179 = vector.broadcast %178 : vector<16x1xf32> to vector<16x16xf32>
    %180 = arith.subf %176, %179 : vector<16x16xf32>
    %181 = math.exp %180 : vector<16x16xf32>
    %cst_57 = arith.constant dense<0.000000e+00> : vector<16xf32>
    %182 = vector.multi_reduction <add>, %181, %cst_57 [1] : vector<16x16xf32> to vector<16xf32>
    %183 = vector.shape_cast %182 : vector<16xf32> to vector<16x1xf32>
    %184 = vector.broadcast %183 : vector<16x1xf32> to vector<16x16xf32>
    %185 = arith.divf %181, %184 : vector<16x16xf32>
    %186 = arith.truncf %185 : vector<16x16xf32> to vector<16x16xbf16>
    %187 = vector.extract_strided_slice %172 {offsets = [0, 0], sizes = [16, 16], strides = [1, 1]} : vector<16x32xbf16> to vector<16x16xbf16>
    %cst_58 = arith.constant dense<0.000000e+00> : vector<16x16xf32>
    %188 = tpu.matmul %186, %187, %cst_58 {dimension_numbers = #tpu.dot_dimension_numbers<[1], [0], [0], [1], [0, 0, 1, 1], [], []>} : vector<16x16xbf16>, vector<16x16xbf16>, vector<16x16xf32> -> vector<16x16xf32>
    %c0_59 = arith.constant 0 : index
    %c0_60 = arith.constant 0 : index
    %189 = vector.load %arg10[%c0_59, %c0_60] : memref<16x32xf32, #tpu.memory_space<vmem>>, vector<16x16xf32>
    tpu.vector_store %arg10[%c0_59, %c0_60], %188 {strides = array<i32>} : memref<16x32xf32, #tpu.memory_space<vmem>>, vector<16x16xf32>,
    %190 = vector.extract_strided_slice %168 {offsets = [0, 16], sizes = [16, 16], strides = [1, 1]} : vector<16x32xbf16> to vector<16x16xbf16>
    %191 = vector.extract_strided_slice %170 {offsets = [0, 16], sizes = [16, 16], strides = [1, 1]} : vector<16x32xbf16> to vector<16x16xbf16>
    %cst_61 = arith.constant dense<0.000000e+00> : vector<16x16xf32>
    %192 = tpu.matmul %190, %191, %cst_61 {dimension_numbers = #tpu.dot_dimension_numbers<[1], [1], [0], [0], [0, 0, 1, 0], [], []>} : vector<16x16xbf16>, vector<16x16xbf16>, vector<16x16xf32> -> vector<16x16xf32>
    %193 = arith.addf %192, %24 : vector<16x16xf32>
    %cst_62 = arith.constant dense<0xFF800000> : vector<16xf32>
    %194 = vector.multi_reduction <maximumf>, %193, %cst_62 [1] : vector<16x16xf32> to vector<16xf32>
    %195 = vector.shape_cast %194 : vector<16xf32> to vector<16x1xf32>
    %196 = vector.broadcast %195 : vector<16x1xf32> to vector<16x16xf32>
    %197 = arith.subf %193, %196 : vector<16x16xf32>
    %198 = math.exp %197 : vector<16x16xf32>
    %cst_63 = arith.constant dense<0.000000e+00> : vector<16xf32>
    %199 = vector.multi_reduction <add>, %198, %cst_63 [1] : vector<16x16xf32> to vector<16xf32>
    %200 = vector.shape_cast %199 : vector<16xf32> to vector<16x1xf32>
    %201 = vector.broadcast %200 : vector<16x1xf32> to vector<16x16xf32>
    %202 = arith.divf %198, %201 : vector<16x16xf32>
    %203 = arith.truncf %202 : vector<16x16xf32> to vector<16x16xbf16>
    %204 = vector.extract_strided_slice %172 {offsets = [0, 16], sizes = [16, 16], strides = [1, 1]} : vector<16x32xbf16> to vector<16x16xbf16>
    %cst_64 = arith.constant dense<0.000000e+00> : vector<16x16xf32>
    %205 = tpu.matmul %203, %204, %cst_64 {dimension_numbers = #tpu.dot_dimension_numbers<[1], [0], [0], [1], [0, 0, 1, 1], [], []>} : vector<16x16xbf16>, vector<16x16xbf16>, vector<16x16xf32> -> vector<16x16xf32>
    %c0_65 = arith.constant 0 : index
    %c16_66 = arith.constant 16 : index
    %206 = vector.load %arg10[%c0_65, %c16_66] : memref<16x32xf32, #tpu.memory_space<vmem>>, vector<16x16xf32>
    tpu.vector_store %arg10[%c0_65, %c16_66], %205 {strides = array<i32>} : memref<16x32xf32, #tpu.memory_space<vmem>>, vector<16x16xf32>,
    %c0_67 = arith.constant 0 : index
    %c0_68 = arith.constant 0 : index
    %207 = vector.load %arg10[%c0_67, %c0_68] : memref<16x32xf32, #tpu.memory_space<vmem>>, vector<16x32xf32>
    %c1_69 = arith.constant 1 : index
    %c0_70 = arith.constant 0 : index
    %c0_71 = arith.constant 0 : index
    %208 = vector.load %arg4[%c1_69, %c0_70, %c0_71] : memref<2x32x32xbf16, #tpu.memory_space<vmem>>, vector<1x32x32xbf16>
    %209 = vector.shape_cast %208 : vector<1x32x32xbf16> to vector<32x32xbf16>
    %210 = arith.truncf %207 : vector<16x32xf32> to vector<16x32xbf16>
    %cst_72 = arith.constant dense<0.000000e+00> : vector<16x32xf32>
    %211 = tpu.matmul %210, %209, %cst_72 {dimension_numbers = #tpu.dot_dimension_numbers<[1], [0], [0], [1], [0, 0, 1, 1], [], []>} : vector<16x32xbf16>, vector<32x32xbf16>, vector<16x32xf32> -> vector<16x32xf32>
    %212 = vector.broadcast %154 : vector<1x32xf32> to vector<16x32xf32>
    %213 = arith.addf %211, %212 : vector<16x32xf32>
    %214 = arith.addf %213, %152 : vector<16x32xf32>
    %cst_73 = arith.constant dense<0.000000e+00> : vector<16xf32>
    %215 = vector.multi_reduction <add>, %214, %cst_73 [1] : vector<16x32xf32> to vector<16xf32>
    %216 = vector.shape_cast %215 : vector<16xf32> to vector<16x1xf32>
    %cst_74 = arith.constant 3.200000e+01 : f32
    %217 = vector.broadcast %cst_74 : f32 to vector<16x1xf32>
    %218 = arith.divf %216, %217 : vector<16x1xf32>
    %219 = vector.broadcast %218 : vector<16x1xf32> to vector<16x32xf32>
    %220 = arith.subf %214, %219 : vector<16x32xf32>
    %221 = arith.mulf %220, %220 : vector<16x32xf32>
    %cst_75 = arith.constant dense<0.000000e+00> : vector<16xf32>
    %222 = vector.multi_reduction <add>, %221, %cst_75 [1] : vector<16x32xf32> to vector<16xf32>
    %223 = vector.shape_cast %222 : vector<16xf32> to vector<16x1xf32>
    %cst_76 = arith.constant 3.200000e+01 : f32
    %224 = vector.broadcast %cst_76 : f32 to vector<16x1xf32>
    %225 = arith.divf %223, %224 : vector<16x1xf32>
    %cst_77 = arith.constant 9.99999996E-13 : f32
    %226 = vector.broadcast %cst_77 : f32 to vector<16x1xf32>
    %227 = arith.addf %225, %226 : vector<16x1xf32>
    %228 = math.rsqrt %227 : vector<16x1xf32>
    %229 = vector.broadcast %228 : vector<16x1xf32> to vector<16x32xf32>
    %230 = arith.mulf %220, %229 : vector<16x32xf32>
    %231 = vector.broadcast %155 : vector<1x32xf32> to vector<16x32xf32>
    %232 = arith.mulf %230, %231 : vector<16x32xf32>
    %233 = vector.broadcast %156 : vector<1x32xf32> to vector<16x32xf32>
    %234 = arith.addf %232, %233 : vector<16x32xf32>
    %c1_78 = arith.constant 1 : index
    %c0_79 = arith.constant 0 : index
    %c0_80 = arith.constant 0 : index
    %235 = vector.load %arg5[%c1_78, %c0_79, %c0_80] : memref<2x32x64xbf16, #tpu.memory_space<vmem>>, vector<1x32x64xbf16>
    %236 = vector.shape_cast %235 : vector<1x32x64xbf16> to vector<32x64xbf16>
    %237 = arith.truncf %234 : vector<16x32xf32> to vector<16x32xbf16>
    %cst_81 = arith.constant dense<0.000000e+00> : vector<16x64xf32>
    %238 = tpu.matmul %237, %236, %cst_81 {dimension_numbers = #tpu.dot_dimension_numbers<[1], [0], [0], [1], [0, 0, 1, 1], [], []>} : vector<16x32xbf16>, vector<32x64xbf16>, vector<16x64xf32> -> vector<16x64xf32>
    %239 = vector.broadcast %157 : vector<1x64xf32> to vector<16x64xf32>
    %240 = arith.addf %238, %239 : vector<16x64xf32>
    %cst_82 = arith.constant 5.000000e-01 : f32
    %241 = vector.broadcast %cst_82 : f32 to vector<16x64xf32>
    %242 = arith.mulf %241, %240 : vector<16x64xf32>
    %cst_83 = arith.constant 4.471500e-02 : f32
    %243 = vector.broadcast %cst_83 : f32 to vector<16x64xf32>
    %244 = arith.mulf %243, %240 : vector<16x64xf32>
    %245 = arith.mulf %244, %240 : vector<16x64xf32>
    %246 = arith.mulf %245, %240 : vector<16x64xf32>
    %247 = arith.addf %240, %246 : vector<16x64xf32>
    %cst_84 = arith.constant 0.797884583 : f32
    %248 = vector.broadcast %cst_84 : f32 to vector<16x64xf32>
    %249 = arith.mulf %248, %247 : vector<16x64xf32>
    %250 = math.tanh %249 : vector<16x64xf32>
    %cst_85 = arith.constant 1.000000e+00 : f32
    %251 = vector.broadcast %cst_85 : f32 to vector<16x64xf32>
    %252 = arith.addf %251, %250 : vector<16x64xf32>
    %253 = arith.mulf %242, %252 : vector<16x64xf32>
    %c1_86 = arith.constant 1 : index
    %c0_87 = arith.constant 0 : index
    %c0_88 = arith.constant 0 : index
    %254 = vector.load %arg6[%c1_86, %c0_87, %c0_88] : memref<2x64x32xbf16, #tpu.memory_space<vmem>>, vector<1x64x32xbf16>
    %255 = vector.shape_cast %254 : vector<1x64x32xbf16> to vector<64x32xbf16>
    %256 = arith.truncf %253 : vector<16x64xf32> to vector<16x64xbf16>
    %cst_89 = arith.constant dense<0.000000e+00> : vector<16x32xf32>
    %257 = tpu.matmul %256, %255, %cst_89 {dimension_numbers = #tpu.dot_dimension_numbers<[1], [0], [0], [1], [0, 0, 1, 1], [], []>} : vector<16x64xbf16>, vector<64x32xbf16>, vector<16x32xf32> -> vector<16x32xf32>
    %258 = vector.broadcast %158 : vector<1x32xf32> to vector<16x32xf32>
    %259 = arith.addf %257, %258 : vector<16x32xf32>
    %260 = arith.addf %259, %234 : vector<16x32xf32>
    %cst_90 = arith.constant dense<0.000000e+00> : vector<16xf32>
    %261 = vector.multi_reduction <add>, %260, %cst_90 [1] : vector<16x32xf32> to vector<16xf32>
    %262 = vector.shape_cast %261 : vector<16xf32> to vector<16x1xf32>
    %cst_91 = arith.constant 3.200000e+01 : f32
    %263 = vector.broadcast %cst_91 : f32 to vector<16x1xf32>
    %264 = arith.divf %262, %263 : vector<16x1xf32>
    %265 = vector.broadcast %264 : vector<16x1xf32> to vector<16x32xf32>
    %266 = arith.subf %260, %265 : vector<16x32xf32>
    %267 = arith.mulf %266, %266 : vector<16x32xf32>
    %cst_92 = arith.constant dense<0.000000e+00> : vector<16xf32>
    %268 = vector.multi_reduction <add>, %267, %cst_92 [1] : vector<16x32xf32> to vector<16xf32>
    %269 = vector.shape_cast %268 : vector<16xf32> to vector<16x1xf32>
    %cst_93 = arith.constant 3.200000e+01 : f32
    %270 = vector.broadcast %cst_93 : f32 to vector<16x1xf32>
    %271 = arith.divf %269, %270 : vector<16x1xf32>
    %cst_94 = arith.constant 9.99999996E-13 : f32
    %272 = vector.broadcast %cst_94 : f32 to vector<16x1xf32>
    %273 = arith.addf %271, %272 : vector<16x1xf32>
    %274 = math.rsqrt %273 : vector<16x1xf32>
    %275 = vector.broadcast %274 : vector<16x1xf32> to vector<16x32xf32>
    %276 = arith.mulf %266, %275 : vector<16x32xf32>
    %277 = vector.broadcast %159 : vector<1x32xf32> to vector<16x32xf32>
    %278 = arith.mulf %276, %277 : vector<16x32xf32>
    %279 = vector.broadcast %160 : vector<1x32xf32> to vector<16x32xf32>
    %280 = arith.addf %278, %279 : vector<16x32xf32>
    %c0_95 = arith.constant 0 : index
    %c0_96 = arith.constant 0 : index
    %281 = vector.load %arg7[%c0_95, %c0_96] : memref<32x32xbf16, #tpu.memory_space<vmem>>, vector<32x32xbf16>
    %282 = arith.truncf %280 : vector<16x32xf32> to vector<16x32xbf16>
    %cst_97 = arith.constant dense<0.000000e+00> : vector<16x32xf32>
    %283 = tpu.matmul %282, %281, %cst_97 {dimension_numbers = #tpu.dot_dimension_numbers<[1], [0], [0], [1], [0, 0, 1, 1], [], []>} : vector<16x32xbf16>, vector<32x32xbf16>, vector<16x32xf32> -> vector<16x32xf32>
    %284 = vector.extract_strided_slice %0 {offsets = [18, 0], sizes = [1, 32], strides = [1, 1]} : vector<20x128xf32> to vector<1x32xf32>
    %285 = vector.broadcast %284 : vector<1x32xf32> to vector<16x32xf32>
    %286 = arith.addf %283, %285 : vector<16x32xf32>
    %287 = math.tanh %286 : vector<16x32xf32>
    %c0_98 = arith.constant 0 : index
    %c0_99 = arith.constant 0 : index
    %288 = vector.load %arg8[%c0_98, %c0_99] : memref<32x128xbf16, #tpu.memory_space<vmem>>, vector<32x128xbf16>
    %289 = arith.truncf %287 : vector<16x32xf32> to vector<16x32xbf16>
    %cst_100 = arith.constant dense<0.000000e+00> : vector<16x128xf32>
    %290 = tpu.matmul %289, %288, %cst_100 {dimension_numbers = #tpu.dot_dimension_numbers<[1], [0], [0], [1], [0, 0, 1, 1], [], []>} : vector<16x32xbf16>, vector<32x128xbf16>, vector<16x128xf32> -> vector<16x128xf32>
    %291 = vector.extract_strided_slice %0 {offsets = [19, 0], sizes = [1, 128], strides = [1, 1]} : vector<20x128xf32> to vector<1x128xf32>
    %292 = vector.broadcast %291 : vector<1x128xf32> to vector<16x128xf32>
    %293 = arith.addf %290, %292 : vector<16x128xf32>
    %cst_101 = arith.constant dense<0xFF800000> : vector<16xf32>
    %294 = vector.multi_reduction <maximumf>, %293, %cst_101 [1] : vector<16x128xf32> to vector<16xf32>
    %295 = vector.shape_cast %294 : vector<16xf32> to vector<16x1xf32>
    %296 = vector.broadcast %295 : vector<16x1xf32> to vector<16x128xf32>
    %297 = arith.subf %293, %296 : vector<16x128xf32>
    %298 = math.exp %297 : vector<16x128xf32>
    %cst_102 = arith.constant dense<0.000000e+00> : vector<16xf32>
    %299 = vector.multi_reduction <add>, %298, %cst_102 [1] : vector<16x128xf32> to vector<16xf32>
    %300 = vector.shape_cast %299 : vector<16xf32> to vector<16x1xf32>
    %301 = vector.broadcast %300 : vector<16x1xf32> to vector<16x128xf32>
    %302 = arith.divf %298, %301 : vector<16x128xf32>
    %c0_103 = arith.constant 0 : index
    %c0_104 = arith.constant 0 : index
    %303 = vector.load %arg9[%c0_103, %c0_104] : memref<16x128xf32, #tpu.memory_space<vmem>>, vector<16x128xf32>
    tpu.vector_store %arg9[%c0_103, %c0_104], %302 {strides = array<i32>} : memref<16x128xf32, #tpu.memory_space<vmem>>, vector<16x128xf32>,
    return
  }
}

</mosaic_0001>

<bundles_post_ra>
// kernel: tpu_custom_call.1
= control target key start
LH: loop header
LB: loop body
LE: loop exit
PB: predicated region body
PF: predicated region fallthrough
CT: control target
= control target key end

     0   :  { %14 = vsyncpa [#allocation4], 0  ;;  %s2044_s0 = inlined_call_operand.hbm [shape: f32[16,32], index: 0, kind: input, shape index: {}]   ;;  %s2045_s1 = inlined_call_operand.hbm [shape: f32[16,16], index: 1, kind: input, shape index: {}]   ;;  %s2046_s2 = inlined_call_operand.hbm [shape: f32[20,128], index: 2, kind: input, shape index: {}]   ;;  %s2047_s3 = inlined_call_operand.vmem [shape: bf16[2,32,96], index: 3, kind: input, shape index: {}]   ;;  %s2048_s4 = inlined_call_operand.vmem [shape: bf16[2,32,32], index: 4, kind: input, shape index: {}]   ;;  %s2049_s5 = inlined_call_operand.vmem [shape: bf16[2,32,64], index: 5, kind: input, shape index: {}]   ;;  %s2050_s6 = inlined_call_operand.vmem [shape: bf16[2,64,32], index: 6, kind: input, shape index: {}]   ;;  %s2051_s7 = inlined_call_operand.hbm [shape: bf16[32,32], index: 7, kind: input, shape index: {}]   ;;  %s2052_s8 = inlined_call_operand.hbm [shape: bf16[32,128], index: 8, kind: input, shape index: {}]   ;;  %s2053_s9 = inlined_call_operand.hbm [shape: f32[16,128], index: 9, kind: output, shape index: {}]  }
   0x1   :  { %15 = vsyncpa [#allocation7], 0 }
   0x2   :  { %16 = vsyncpa [#allocation10], 0 }
   0x3   :  { %17 = vsyncpa [#allocation5], 0  ;;  %s35_s11 = sshll.u32 %s2045_s1, 4  ;;  %s1689_s12 = smov [#allocation6]   ;;  %s36_s11 = int_to_ptr.hbm [resolvable:$true] %s35_s11 }
   0x4   :  { %s37_s13 = sshll.u32 %s1689_s12, 4  ;;  %s69_s16 = sshll.u32 %s2051_s7, 4  ;;  %s38_s13 = int_to_ptr.vmem [resolvable:$true] %s37_s13  ;;  %s70_s16 = int_to_ptr.hbm [resolvable:$true] %s69_s16 }
   0x5   :  { %s1690_s17 = smov 128   ;;  %s1691_s18 = smov 8  }
   0x6   :  { %43 = dma.hbm_to_vmem [thread:$0]  %s36_s11, 256, %s38_s13, [#allocation7], %s1690_s17, %s1690_s17, %s1691_s18  }
   0x7   :  { %s1692_s19 = smov [#allocation9]   ;;  %s1693_s21 = smov 64  }
   0x8   :  { %s71_s20 = sshll.u32 %s1692_s19, 4  ;;  %s1694_s1 = smov 4   ;;  %s72_s20 = int_to_ptr.vmem [resolvable:$true] %s71_s20 }
   0x9   :  { %77 = dma.hbm_to_vmem [thread:$0]  %s70_s16, 256, %s72_s20, [#allocation10], %s1693_s21, %s1693_s21, %s1694_s1  }
   0xa   :  { %s22_s24 = sshll.u32 %s2044_s0, 4  ;;  %s1695_s7 = smov [#allocation3]   ;;  %s23_s24 = int_to_ptr.hbm [resolvable:$true] %s22_s24 }
   0xb   :  { %s24_s25 = sshll.u32 %s1695_s7, 4  ;;  %s48_s28 = sshll.u32 %s2046_s2, 4  ;;  %s25_s25 = int_to_ptr.vmem [resolvable:$true] %s24_s25  ;;  %s49_s28 = int_to_ptr.hbm [resolvable:$true] %s48_s28 }
   0xc   :  { %30 = dma.hbm_to_vmem [thread:$0]  %s23_s24, 256, %s25_s25, [#allocation4], %s1690_s17, %s1690_s17, %s1691_s18  }
   0xd   :  { %s1696_s29 = smov [#allocation8]   ;;  %s82_s12 = sshll.u32 %s2052_s8, 4  ;;  %s83_s12 = int_to_ptr.hbm [resolvable:$true] %s82_s12 }
   0xe   :  { %s50_s30 = sshll.u32 %s1696_s29, 4  ;;  %s1697_s0 = smov [#allocation11]   ;;  %s51_s30 = int_to_ptr.vmem [resolvable:$true] %s50_s30 }
   0xf   :  { %56 = dma.hbm_to_vmem [thread:$0]  %s49_s28, 384, %s51_s30, [#allocation7], %s1690_s17, %s1690_s17, %s1691_s18  }
  0x10   :  { %s84_s13 = sshll.u32 %s1697_s0, 4  ;;  %s85_s13 = int_to_ptr.vmem [resolvable:$true] %s84_s13 }
  0x11   :  { %90 = dma.hbm_to_vmem [thread:$0]  %s83_s12, 256, %s85_s13, [#allocation10], %s1693_s21, %s1693_s21, %s1694_s1  }
  0x12   :  { %1681 = dma.done.wait [#allocation4], 256  }
  0x13   :  { %1682 = vsyncadd [#allocation4], 4294967040 }
  0x14   :  { %1683 = dma.done.wait [#allocation7], 640  }
  0x15   :  { %1684 = vsyncadd [#allocation7], 4294966656 }
  0x16   :  { %1685 = dma.done.wait [#allocation10], 512  }
  0x17   :  { %1686 = vsyncadd [#allocation10], 4294966784  ;;  %vm117_vm0 = vcmask 261120   ;;  %v115_v0 = vld [vmem:[#allocation3] sm:$0xff]  ;;  %v116_v2 = vld [vmem:[#allocation3 + $0x8] sm:$0xff]  ;;  %v1698_v4 = vmov 32.0  }
  0x18   :  { %v118_v1 = vsel %vm117_vm0, %v115_v0, 0.0  ;;  %v121_v3 = vsel %vm117_vm0, %v116_v2, 0.0  ;;  %1463 = vrcp.f32 %v1698_v4  ;;  %v1424_v21 = vld [vmem:[%s2047_s3 + $0x8] sm:$0xff]  ;;  %v1423_v23 = vld [vmem:[%s2047_s3] sm:$0xff]  ;;  %v1799_v40 = vld [vmem:[#allocation8] sm:$0xff]  ;;  %s1699_s16 = smov 112  }
  0x19   :  { %119 = vadd.xlane.f32.xlu0 %v118_v1  ;;  %204 = vmatpush.bf16.msra.mxu0 %v1424_v21  ;;  %v169_v43 = vperm.slane %v1799_v40, 0  ;;  %v172_v48 = vperm.slane %v1799_v40, 1  ;;  %v182_v54 = vperm.slane %v1799_v40, 2  ;;  %s1700_s19 = smov 96   ;;  %s1701_s20 = smov 80   ;;  %vm221_vm8 = vcmask 130048  }
  0x1a   :  { %v1824_v4 = vld [vmem:[#allocation6] sm:$0xff]  ;;  %s1702_s1 = smov 48   ;;  %s1703_s22 = smov 16  }
  0x1b   :  { %s1274_s0 = sshll.u32 %s2053_s9, 4  ;;  %s1275_s0 = int_to_ptr.hbm [resolvable:$true] %s1274_s0 }
  0x1d   :  { %205 = vmatpush.bf16.msra.mxu0 %v1423_v23 }
  0x1e   :  { %v1464_v5 = vpop.eup %1463 }
  0x1f   :  { %v125_v6 = vmul.f32 32.0, %v1464_v5  ;;  %vm129_vm1 = vweird.f32 %v1464_v5 }
  0x21   :  { %122 = vadd.xlane.f32.xlu0 %v121_v3  ;;  %v126_v7 = vsub.f32 1.0, %v125_v6 }
  0x23   :  { %v127_v8 = vmul.f32 %v1464_v5, %v126_v7 }
  0x25   :  { %v128_v9 = vadd.f32 %v1464_v5, %v127_v8  ;;  %v1828_v8 = vld [vmem:[#allocation6 + $0x8] sm:$0xff] }
  0x27   :  { %v1785_v10 = vsel %vm129_vm1, %v1464_v5, %v128_v9 }
  0x8c   :  { %v120_v11 = vpop.xlane.xlu0 %119 }
  0x8d   :  { %v131_v12 = vmul.f32 %v1785_v10, %v120_v11 }
  0x8f   :  { %v133_v13 = vsub.f32 %v115_v0, %v131_v12 }
  0x91   :  { %v135_v14 = vmul.f32 %v133_v13, %v133_v13 }
  0x93   :  { %v137_v15 = vsel %vm117_vm0, %v135_v14, 0.0 }
  0x94   :  { %138 = vadd.xlane.f32.xlu1 %v137_v15  ;;  %v123_v16 = vpop.xlane.xlu0 %122 }
  0x95   :  { %v132_v17 = vmul.f32 %v1785_v10, %v123_v16 }
  0x97   :  { %v134_v18 = vsub.f32 %v116_v2, %v132_v17 }
  0x99   :  { %v136_v19 = vmul.f32 %v134_v18, %v134_v18 }
  0x9b   :  { %v140_v20 = vsel %vm117_vm0, %v136_v19, 0.0 }
  0x9c   :  { %141 = vadd.xlane.f32.xlu1 %v140_v20 }
 0x107   :  { %v139_v22 = vpop.xlane.xlu1 %138 }
 0x108   :  { %v143_v24 = vmul.f32 %v139_v22, %v1785_v10 }
 0x10a   :  { %v145_v25 = vadd.f32 1e-12, %v143_v24 }
 0x10c   :  { %1465 = vrsqrt.f32 %v145_v25  ;;  %vm153_vm3 = vweird.f32 %v145_v25 }
 0x10f   :  { %v142_v26 = vpop.xlane.xlu1 %141 }
 0x110   :  { %v144_v27 = vmul.f32 %v142_v26, %v1785_v10 }
 0x112   :  { %v1466_v28 = vpop.eup %1465  ;;  %v146_v29 = vadd.f32 1e-12, %v144_v27 }
 0x113   :  { %v148_v30 = vmul.f32 %v1466_v28, %v145_v25  ;;  %vm154_vm2 = vweird.f32 %v1466_v28 }
 0x114   :  { %1467 = vrsqrt.f32 %v146_v29  ;;  %vm155_vm4 = vmor %vm153_vm3, %vm154_vm2  ;;  %vm163_vm6 = vweird.f32 %v146_v29 }
 0x115   :  { %v149_v31 = vmul.f32 %v1466_v28, %v148_v30 }
 0x117   :  { %v150_v32 = vmul.f32 0.5, %v149_v31 }
 0x119   :  { %v151_v33 = vsub.f32 1.5, %v150_v32 }
 0x11a   :  { %v1468_v34 = vpop.eup %1467 }
 0x11b   :  { %v152_v35 = vmul.f32 %v1466_v28, %v151_v33  ;;  %v158_v36 = vmul.f32 %v1468_v34, %v146_v29  ;;  %vm164_vm5 = vweird.f32 %v1468_v34 }
 0x11c   :  { %vm165_vm7 = vmor %vm163_vm6, %vm164_vm5 }
 0x11d   :  { %v159_v37 = vmul.f32 %v1468_v34, %v158_v36  ;;  %v156_v38 = vsel %vm155_vm4, %v1466_v28, %v152_v35 }
 0x11e   :  { %v167_v42 = vmul.f32 %v156_v38, %v133_v13 }
 0x11f   :  { %v160_v39 = vmul.f32 0.5, %v159_v37 }
 0x120   :  { %v170_v47 = vmul.f32 %v169_v43, %v167_v42 }
 0x121   :  { %v161_v41 = vsub.f32 1.5, %v160_v39 }
 0x122   :  { %v1803_v50 = vadd.f32 %v172_v48, %v170_v47 }
 0x123   :  { %v162_v44 = vmul.f32 %v1468_v34, %v161_v41 }
 0x125   :  { %v166_v45 = vsel %vm165_vm7, %v1468_v34, %v162_v44 }
 0x126   :  { %v168_v46 = vmul.f32 %v166_v45, %v134_v18 }
 0x128   :  { %v171_v49 = vmul.f32 %v169_v43, %v168_v46 }
 0x12a   :  { %v1805_v51 = vadd.f32 %v172_v48, %v171_v49 }
 0x12c   :  { %v181_v52 = vpack.c.bf16 %v1805_v51, %v1803_v50 }
 0x12e   :  { %1297 = vmatmul.msk.bf16.vlgmr.msra.gmra.mxu0 %vm117_vm0, %v181_v52 }
 0x1ab   :  { %v207_v53 = vpop.f32.mrf.mxu0 }
 0x1ac   :  { %v208_v55 = vadd.f32 %v207_v53, %v182_v54 }
 0x1ae   :  { %v212_v57 = vpack.c.bf16 %v208_v55, %v208_v55 }
 0x1b0   :  { %v216_v60 = vunpack.c.l.b16 %v212_v57 }
 0x1b3   :  { %v209_v56 = vpop.f32.mrf.mxu0 }
 0x1b4   :  { %v210_v58 = vadd.f32 %v209_v56, %v182_v54 }
 0x1b6   :  { %v213_v59 = vpack.c.bf16 %v210_v58, %v210_v58 }
 0x1b8   :  { %v217_v61 = vunpack.c.l.b16 %v213_v59 }
 0x1ba   :  { %v1811_v62 = vpack.c.b16 %v217_v61, %v216_v60 }
 0x1bc   :  { %313 = vrot.lane.b32.xlu0 %v1811_v62, %s1699_s16  ;;  %219 = vrot.lane.b32.xlu2 %v1811_v62, %s1700_s19 }
 0x1c4   :  { %315 = vrot.lane.b32.xlu2 %v1811_v62, %s1701_s20 }
 0x216   :  { %v220_v63 = vpop.permute.xlu2 %219 }
 0x217   :  { %v226_v0 = vsel %vm221_vm8, %v220_v63, 0 }
 0x218   :  { %235 = vmatpush.bf16.xpose.msra.mxu1 %v226_v0 }
 0x21e   :  { %v316_v1 = vpop.permute.xlu2 %315 }
 0x21f   :  { %1298 = vmatmul.msk.bf16.vlgmr.msra.gmra.mxu1 %vm221_vm8, %v1811_v62  ;;  %v321_v2 = vsel %vm221_vm8, %v316_v1, 0 }
 0x220   :  { %330 = vmatpush.bf16.xpose.msra.mxu3 %v321_v2 }
 0x22e   :  { %v314_v3 = vpop.permute.xlu0 %313 }
 0x22f   :  { %1300 = vmatmul.msk.bf16.vlgmr.msra.gmra.mxu3 %vm221_vm8, %v314_v3 }
 0x29c   :  { %v237_v5 = vpop.f32.mrf.mxu1 }
 0x29d   :  { %v238_v6 = vadd.f32 %v237_v5, %v1824_v4 }
 0x29f   :  { %v242_v7 = vsel %vm221_vm8, %v238_v6, -inf }
 0x2a0   :  { %243 = vmax.xlane.f32.xlu1 %v242_v7 }
 0x2a4   :  { %v239_v9 = vpop.f32.mrf.mxu1 }
 0x2a5   :  { %v240_v11 = vadd.f32 %v239_v9, %v1828_v8 }
 0x2a7   :  { %v245_v12 = vsel %vm221_vm8, %v240_v11, -inf }
 0x2a8   :  { %246 = vmax.xlane.f32.xlu2 %v245_v12 }
 0x2b2   :  { %v332_v13 = vpop.f32.mrf.mxu3 }
 0x2b3   :  { %v333_v14 = vadd.f32 %v332_v13, %v1824_v4 }
 0x2b5   :  { %v337_v15 = vsel %vm221_vm8, %v333_v14, -inf }
 0x2b6   :  { %338 = vmax.xlane.f32.xlu1 %v337_v15 }
 0x2ba   :  { %v334_v16 = vpop.f32.mrf.mxu3 }
 0x2bb   :  { %v335_v17 = vadd.f32 %v334_v16, %v1828_v8 }
 0x2bd   :  { %v340_v18 = vsel %vm221_vm8, %v335_v17, -inf }
 0x2be   :  { %341 = vmax.xlane.f32.xlu1 %v340_v18 }
 0x2c0   :  { %291 = vrot.lane.b32.xlu2 %v1811_v62, %s1693_s21 }
 0x313   :  { %v244_v19 = vpop.xlane.xlu1 %243 }
 0x314   :  { %v248_v20 = vsub.f32 %v238_v6, %v244_v19 }
 0x316   :  { %v250_v21 = vmul.f32 1.442695, %v248_v20 }
 0x318   :  { %1469 = vpow2.f32 %v250_v21 }
 0x31b   :  { %v247_v22 = vpop.xlane.xlu2 %246 }
 0x31c   :  { %v249_v28 = vsub.f32 %v240_v11, %v247_v22 }
 0x31e   :  { %v1838_v23 = vpop.eup %1469  ;;  %v252_v30 = vmul.f32 1.442695, %v249_v28 }
 0x31f   :  { %v254_v24 = vsel %vm221_vm8, %v1838_v23, 0.0 }
 0x320   :  { %255 = vadd.xlane.f32.xlu0 %v254_v24 }
 0x323   :  { %v292_v25 = vpop.permute.xlu2 %291 }
 0x324   :  { %304 = vmatpush.bf16.msra.mxu2 %v292_v25 }
 0x329   :  { %v339_v26 = vpop.xlane.xlu1 %338 }
 0x32a   :  { %v343_v27 = vsub.f32 %v333_v14, %v339_v26 }
 0x32c   :  { %v345_v29 = vmul.f32 1.442695, %v343_v27 }
 0x32e   :  { %1471 = vpow2.f32 %v345_v29 }
 0x32f   :  { %1473 = vpow2.f32 %v252_v30 }
 0x331   :  { %v342_v31 = vpop.xlane.xlu1 %341 }
 0x332   :  { %v344_v33 = vsub.f32 %v335_v17, %v342_v31 }
 0x334   :  { %v1842_v32 = vpop.eup %1471  ;;  %v347_v35 = vmul.f32 1.442695, %v344_v33 }
 0x335   :  { %v349_v34 = vsel %vm221_vm8, %v1842_v32, 0.0  ;;  %v1474_v36 = vpop.eup %1473 }
 0x336   :  { %350 = vadd.xlane.f32.xlu1 %v349_v34  ;;  %1475 = vpow2.f32 %v347_v35  ;;  %v257_v37 = vsel %vm221_vm8, %v1474_v36, 0.0 }
 0x33c   :  { %v1847_v38 = vpop.eup %1475 }
 0x33d   :  { %v352_v39 = vsel %vm221_vm8, %v1847_v38, 0.0 }
 0x33e   :  { %258 = vadd.xlane.f32.xlu1 %v257_v37 }
 0x346   :  { %353 = vadd.xlane.f32.xlu1 %v352_v39 }
 0x35f   :  { %386 = vrot.lane.b32.xlu1 %v1811_v62, %s1702_s1 }
 0x393   :  { %v256_v41 = vpop.xlane.xlu0 %255 }
 0x394   :  { %1477 = vrcp.f32 %v256_v41  ;;  %vm265_vm10 = vweird.f32 %v256_v41  ;;  %v271_v55 = vand.u32 2147483648, %v256_v41  ;;  %v269_v57 = vand.u32 2147483647, %v256_v41 }
 0x396   :  { %v272_v0 = vor.u32 1.1754944e-38, %v271_v55  ;;  %vm270_vm13 = vcmp.eq.f32.partialorder %v269_v57, 8.507059e+37 }
 0x39a   :  { %v1478_v42 = vpop.eup %1477 }
 0x39b   :  { %v261_v44 = vmul.f32 %v1478_v42, %v256_v41  ;;  %vm266_vm9 = vweird.f32 %v1478_v42 }
 0x39c   :  { %vm1856_vm11 = vmor %vm265_vm10, %vm266_vm9 }
 0x39d   :  { %v262_v45 = vsub.f32 1.0, %v261_v44 }
 0x39f   :  { %v263_v47 = vmul.f32 %v1478_v42, %v262_v45 }
 0x3a1   :  { %v264_v49 = vadd.f32 %v1478_v42, %v263_v47 }
 0x3a3   :  { %v268_v60 = vsel %vm1856_vm11, %v1478_v42, %v264_v49  ;;  %vm414_vm11 = vcmask 261248  }
 0x3a4   :  { %v273_v5 = vsel %vm270_vm13, %v272_v0, %v268_v60 }
 0x3a5   :  { %v274_v13 = vmul.f32 %v1838_v23, %v273_v5  ;;  %v1427_v5 = vld [vmem:[%s2049_s5] sm:$0xff] }
 0x3a9   :  { %v1853_v43 = vpop.xlane.xlu1 %350 }
 0x3aa   :  { %v366_v22 = vand.u32 2147483648, %v1853_v43  ;;  %vm360_vm6 = vweird.f32 %v1853_v43  ;;  %v364_v23 = vand.u32 2147483647, %v1853_v43 }
 0x3ac   :  { %v367_v27 = vor.u32 1.1754944e-38, %v366_v22  ;;  %vm365_vm10 = vcmp.eq.f32.partialorder %v364_v23, 8.507059e+37 }
 0x3b1   :  { %v259_v46 = vpop.xlane.xlu1 %258 }
 0x3b2   :  { %1479 = vrcp.f32 %v259_v46  ;;  %v286_v59 = vand.u32 2147483648, %v259_v46  ;;  %v284_v63 = vand.u32 2147483647, %v259_v46  ;;  %vm280_vm14 = vweird.f32 %v259_v46 }
 0x3b3   :  { %1481 = vrcp.f32 %v1853_v43 }
 0x3b4   :  { %v287_v3 = vor.u32 1.1754944e-38, %v286_v59  ;;  %vm285_vm1 = vcmp.eq.f32.partialorder %v284_v63, 8.507059e+37 }
 0x3b8   :  { %v1480_v48 = vpop.eup %1479 }
 0x3b9   :  { %v276_v52 = vmul.f32 %v1480_v48, %v259_v46  ;;  %v354_v53 = vpop.xlane.xlu1 %353  ;;  %v1482_v54 = vpop.eup %1481  ;;  %vm281_vm12 = vweird.f32 %v1480_v48  ;;  %v424_v46 = vperm.slane %v1799_v40, 3 }
 0x3ba   :  { %1483 = vrcp.f32 %v354_v53  ;;  %v356_v61 = vmul.f32 %v1482_v54, %v1853_v43  ;;  %vm282_vm15 = vmor %vm280_vm14, %vm281_vm12  ;;  %v381_v19 = vand.u32 2147483648, %v354_v53  ;;  %vm361_vm3 = vweird.f32 %v1482_v54 }
 0x3bb   :  { %v277_v58 = vsub.f32 1.0, %v276_v52  ;;  %vm375_vm4 = vweird.f32 %v354_v53  ;;  %v379_v21 = vand.u32 2147483647, %v354_v53  ;;  %vm362_vm7 = vmor %vm360_vm6, %vm361_vm3  ;;  %vm593_vm3 = vcmask 523264  }
 0x3bc   :  { %v357_v6 = vsub.f32 1.0, %v356_v61  ;;  %v382_v25 = vor.u32 1.1754944e-38, %v381_v19 }
 0x3bd   :  { %v278_v62 = vmul.f32 %v1480_v48, %v277_v58  ;;  %vm380_vm9 = vcmp.eq.f32.partialorder %v379_v21, 8.507059e+37 }
 0x3be   :  { %v358_v15 = vmul.f32 %v1482_v54, %v357_v6 }
 0x3bf   :  { %v279_v1 = vadd.f32 %v1480_v48, %v278_v62 }
 0x3c0   :  { %v1484_v2 = vpop.eup %1483  ;;  %v359_v20 = vadd.f32 %v1482_v54, %v358_v15 }
 0x3c1   :  { %v371_v7 = vmul.f32 %v1484_v2, %v354_v53  ;;  %v283_v9 = vsel %vm282_vm15, %v1480_v48, %v279_v1  ;;  %vm376_vm2 = vweird.f32 %v1484_v2 }
 0x3c2   :  { %v288_v11 = vsel %vm285_vm1, %v287_v3, %v283_v9  ;;  %vm377_vm5 = vmor %vm375_vm4, %vm376_vm2  ;;  %v363_v26 = vsel %vm362_vm7, %v1482_v54, %v359_v20 }
 0x3c3   :  { %v372_v12 = vsub.f32 1.0, %v371_v7  ;;  %v289_v14 = vmul.f32 %v1474_v36, %v288_v11  ;;  %v368_v29 = vsel %vm365_vm10, %v367_v27, %v363_v26 }
 0x3c4   :  { %v369_v33 = vmul.f32 %v1842_v32, %v368_v29  ;;  %v1426_v32 = vld [vmem:[%s2048_s4 + $0x8] sm:$0xff] }
 0x3c5   :  { %v373_v16 = vmul.f32 %v1484_v2, %v372_v12  ;;  %v290_v17 = vpack.c.bf16 %v289_v14, %v274_v13  ;;  %446 = vmatpush.bf16.msrb.mxu0 %v1426_v32  ;;  %v1429_v32 = vld [vmem:[%s2050_s6] sm:$0xff] }
 0x3c7   :  { %v374_v18 = vadd.f32 %v1484_v2, %v373_v16  ;;  %1299 = vmatmul.msk.bf16.vlgmr.msra.gmra.mxu2 %vm221_vm8, %v290_v17 }
 0x3c9   :  { %v378_v24 = vsel %vm377_vm5, %v1484_v2, %v374_v18 }
 0x3ca   :  { %v383_v28 = vsel %vm380_vm9, %v382_v25, %v378_v24  ;;  %v500_v25 = vperm.slane %v1799_v40, 4 }
 0x3cb   :  { %v384_v31 = vmul.f32 %v1847_v38, %v383_v28  ;;  %v1425_v38 = vld [vmem:[%s2048_s4] sm:$0xff] }
 0x3cc   :  { %447 = vmatpush.bf16.msrb.mxu0 %v1425_v38  ;;  %v511_v38 = vperm.slane %v1799_v40, 6 }
 0x3cd   :  { %v385_v34 = vpack.c.bf16 %v384_v31, %v369_v33 }
 0x3d1   :  { %v387_v30 = vpop.permute.xlu1 %386 }
 0x3d2   :  { %399 = vmatpush.bf16.msrb.mxu2 %v387_v30  ;;  %v503_v30 = vperm.slane %v1799_v40, 5 }
 0x3d7   :  { %1301 = vmatmul.msk.bf16.vlgmr.msrb.gmra.mxu2 %vm221_vm8, %v385_v34 }
 0x44a   :  { %v306_v35 = vpop.f32.mrf.mxu2 }
 0x44b   :  { %311 = vst.msk [vmem:[#allocation2] sm:$0xff] %vm221_vm8, %v306_v35 }
 0x452   :  { %v308_v36 = vpop.f32.mrf.mxu2 }
 0x453   :  { %312 = vst.msk [vmem:[#allocation2 + $0x8] sm:$0xff] %vm221_vm8, %v308_v36  ;;  %v1432_v36 = vld [vmem:[%s2050_s6 + $0x18] sm:$0xff] }
 0x454   :  { %601 = vmatpush.bf16.msrb.mxu3 %v1432_v36 }
 0x45a   :  { %v401_v37 = vpop.f32.mrf.mxu2 }
 0x45b   :  { %408 = vrot.lane.b32.xlu0 %v401_v37, %s1703_s22  ;;  %v1431_v37 = vld [vmem:[%s2050_s6 + $0x10] sm:$0xff] }
 0x45c   :  { %602 = vmatpush.bf16.msrb.mxu3 %v1431_v37 }
 0x462   :  { %v403_v39 = vpop.f32.mrf.mxu2 }
 0x463   :  { %410 = vrot.lane.b32.xlu2 %v403_v39, %s1703_s22  ;;  %v1430_v39 = vld [vmem:[%s2050_s6 + $0x8] sm:$0xff] }
 0x464   :  { %603 = vmatpush.bf16.msrb.mxu3 %v1430_v39 }
 0x468   :  { %604 = vmatpush.bf16.msrb.mxu3 %v1429_v32  ;;  %v1933_v32 = vld [vmem:[#allocation8 + $0x8] sm:$0xff] }
 0x4bd   :  { %v411_v41 = vpop.permute.xlu2 %410 }
 0x4be   :  { %416 = vst.msk [vmem:[#allocation2 + $0x8] sm:$0xff] %vm414_vm11, %v411_v41 }
 0x4c5   :  { %v418_v44 = vld [vmem:[#allocation2 + $0x8] sm:$0xff] }
 0x4cd   :  { %v409_v42 = vpop.permute.xlu0 %408 }
 0x4ce   :  { %415 = vst.msk [vmem:[#allocation2] sm:$0xff] %vm414_vm11, %v409_v42 }
 0x4d5   :  { %v417_v43 = vld [vmem:[#allocation2] sm:$0xff] }
 0x4d6   :  { %v423_v45 = vpack.c.bf16 %v418_v44, %v417_v43 }
 0x4d8   :  { %1310 = vmatmul.msk.bf16.vlgmr.msrb.gmra.mxu0 %vm117_vm0, %v423_v45 }
 0x555   :  { %v449_v47 = vpop.f32.mrf.mxu0 }
 0x556   :  { %v450_v48 = vadd.f32 %v449_v47, %v424_v46 }
 0x558   :  { %v454_v49 = vadd.f32 %v450_v48, %v1803_v50 }
 0x55a   :  { %v456_v52 = vsel %vm117_vm0, %v454_v49, 0.0 }
 0x55b   :  { %457 = vadd.xlane.f32.xlu1 %v456_v52 }
 0x55d   :  { %v451_v53 = vpop.f32.mrf.mxu0 }
 0x55e   :  { %v452_v54 = vadd.f32 %v451_v53, %v424_v46 }
 0x560   :  { %v455_v55 = vadd.f32 %v452_v54, %v1805_v51  ;;  %v1428_v51 = vld [vmem:[%s2049_s5 + $0x8] sm:$0xff] }
 0x561   :  { %533 = vmatpush.bf16.msrb.mxu1 %v1428_v51 }
 0x562   :  { %v459_v56 = vsel %vm117_vm0, %v455_v55, 0.0 }
 0x563   :  { %460 = vadd.xlane.f32.xlu2 %v459_v56 }
 0x565   :  { %534 = vmatpush.bf16.msrb.mxu1 %v1427_v5 }
 0x5ce   :  { %v458_v57 = vpop.xlane.xlu1 %457 }
 0x5cf   :  { %v462_v58 = vmul.f32 %v458_v57, %v1785_v10 }
 0x5d1   :  { %v464_v59 = vsub.f32 %v454_v49, %v462_v58 }
 0x5d3   :  { %v466_v60 = vmul.f32 %v464_v59, %v464_v59 }
 0x5d5   :  { %v468_v61 = vsel %vm117_vm0, %v466_v60, 0.0 }
 0x5d6   :  { %v461_v62 = vpop.xlane.xlu2 %460  ;;  %469 = vadd.xlane.f32.xlu0 %v468_v61 }
 0x5d7   :  { %v463_v50 = vmul.f32 %v461_v62, %v1785_v10 }
 0x5d9   :  { %v465_v63 = vsub.f32 %v455_v55, %v463_v50 }
 0x5db   :  { %v467_v0 = vmul.f32 %v465_v63, %v465_v63 }
 0x5dd   :  { %v471_v1 = vsel %vm117_vm0, %v467_v0, 0.0 }
 0x5de   :  { %472 = vadd.xlane.f32.xlu2 %v471_v1  ;;  %v568_v1 = vperm.slane %v1799_v40, 7 }
 0x649   :  { %v470_v2 = vpop.xlane.xlu0 %469 }
 0x64a   :  { %v474_v3 = vmul.f32 %v470_v2, %v1785_v10 }
 0x64c   :  { %v476_v6 = vadd.f32 1e-12, %v474_v3 }
 0x64e   :  { %1485 = vrsqrt.f32 %v476_v6  ;;  %vm484_vm13 = vweird.f32 %v476_v6 }
 0x651   :  { %v473_v7 = vpop.xlane.xlu2 %472 }
 0x652   :  { %v475_v9 = vmul.f32 %v473_v7, %v1785_v10 }
 0x654   :  { %v1486_v11 = vpop.eup %1485  ;;  %v477_v12 = vadd.f32 1e-12, %v475_v9 }
 0x655   :  { %v479_v13 = vmul.f32 %v1486_v11, %v476_v6  ;;  %vm485_vm12 = vweird.f32 %v1486_v11 }
 0x656   :  { %1487 = vrsqrt.f32 %v477_v12  ;;  %vm486_vm14 = vmor %vm484_vm13, %vm485_vm12  ;;  %vm494_vm1 = vweird.f32 %v477_v12 }
 0x657   :  { %v480_v14 = vmul.f32 %v1486_v11, %v479_v13 }
 0x659   :  { %v481_v15 = vmul.f32 0.5, %v480_v14 }
 0x65b   :  { %v482_v16 = vsub.f32 1.5, %v481_v15 }
 0x65c   :  { %v1488_v17 = vpop.eup %1487 }
 0x65d   :  { %v483_v18 = vmul.f32 %v1486_v11, %v482_v16  ;;  %v489_v19 = vmul.f32 %v1488_v17, %v477_v12  ;;  %vm495_vm15 = vweird.f32 %v1488_v17 }
 0x65e   :  { %vm496_vm2 = vmor %vm494_vm1, %vm495_vm15 }
 0x65f   :  { %v490_v20 = vmul.f32 %v1488_v17, %v489_v19  ;;  %v487_v21 = vsel %vm486_vm14, %v1486_v11, %v483_v18 }
 0x660   :  { %v498_v24 = vmul.f32 %v487_v21, %v464_v59  ;;  %v1434_v21 = vld [vmem:[%s2047_s3 + $0x18] sm:$0xff] }
 0x661   :  { %v491_v22 = vmul.f32 0.5, %v490_v20  ;;  %691 = vmatpush.bf16.msra.mxu2 %v1434_v21 }
 0x662   :  { %v501_v29 = vmul.f32 %v500_v25, %v498_v24 }
 0x663   :  { %v492_v23 = vsub.f32 1.5, %v491_v22 }
 0x664   :  { %v504_v33 = vadd.f32 %v503_v30, %v501_v29 }
 0x665   :  { %v493_v26 = vmul.f32 %v1488_v17, %v492_v23 }
 0x667   :  { %v497_v27 = vsel %vm496_vm2, %v1488_v17, %v493_v26 }
 0x668   :  { %v499_v28 = vmul.f32 %v497_v27, %v465_v63 }
 0x66a   :  { %v502_v31 = vmul.f32 %v500_v25, %v499_v28  ;;  %v1433_v25 = vld [vmem:[%s2047_s3 + $0x10] sm:$0xff] }
 0x66b   :  { %692 = vmatpush.bf16.msra.mxu2 %v1433_v25 }
 0x66c   :  { %v505_v34 = vadd.f32 %v503_v30, %v502_v31 }
 0x66e   :  { %v510_v35 = vpack.c.bf16 %v505_v34, %v504_v33 }
 0x670   :  { %1319 = vmatmul.msk.bf16.vlgmr.msrb.gmra.mxu1 %vm117_vm0, %v510_v35 }
 0x6ed   :  { %v536_v41 = vpop.f32.mrf.mxu1 }
 0x6ee   :  { %v537_v42 = vadd.f32 %v536_v41, %v511_v38 }
 0x6f0   :  { %v543_v43 = vmul.f32 0.044715, %v537_v42  ;;  %v541_v60 = vmul.f32 0.5, %v537_v42 }
 0x6f2   :  { %v545_v44 = vmul.f32 %v543_v43, %v537_v42  ;;  %v657_v43 = vperm.slane %v1933_v32, 0 }
 0x6f4   :  { %v547_v45 = vmul.f32 %v545_v44, %v537_v42 }
 0x6f5   :  { %v538_v46 = vpop.f32.mrf.mxu1 }
 0x6f6   :  { %v549_v47 = vadd.f32 %v547_v45, %v537_v42  ;;  %v539_v48 = vadd.f32 %v538_v46, %v511_v38 }
 0x6f8   :  { %v544_v49 = vmul.f32 0.044715, %v539_v48  ;;  %v551_v52 = vmul.f32 0.7978846, %v549_v47  ;;  %v542_v61 = vmul.f32 0.5, %v539_v48  ;;  %v660_v47 = vperm.slane %v1933_v32, 1 }
 0x6fa   :  { %v546_v53 = vmul.f32 %v544_v49, %v539_v48  ;;  %1489 = vtanh.f32 %v551_v52 }
 0x6fc   :  { %v548_v54 = vmul.f32 %v546_v53, %v539_v48 }
 0x6fe   :  { %v550_v55 = vadd.f32 %v548_v54, %v539_v48 }
 0x700   :  { %v552_v56 = vmul.f32 0.7978846, %v550_v55  ;;  %v1490_v57 = vpop.eup %1489 }
 0x701   :  { %v555_v58 = vadd.f32 1.0, %v1490_v57  ;;  %v669_v57 = vperm.slane %v1933_v32, 2 }
 0x702   :  { %1491 = vtanh.f32 %v552_v56 }
 0x703   :  { %v557_v50 = vmul.f32 %v555_v58, %v541_v60 }
 0x708   :  { %v1492_v59 = vpop.eup %1491 }
 0x709   :  { %v556_v62 = vadd.f32 1.0, %v1492_v59 }
 0x70b   :  { %v558_v63 = vmul.f32 %v556_v62, %v542_v61 }
 0x70d   :  { %v567_v0 = vpack.c.bf16 %v558_v63, %v557_v50 }
 0x70f   :  { %1336 = vmatmul.msk.bf16.vlgmr.msrb.gmra.mxu3 %vm593_vm3, %v567_v0 }
 0x792   :  { %v606_v51 = vpop.f32.mrf.mxu3 }
 0x793   :  { %v607_v2 = vadd.f32 %v606_v51, %v568_v1 }
 0x795   :  { %v611_v3 = vadd.f32 %v607_v2, %v504_v33 }
 0x797   :  { %v613_v5 = vsel %vm117_vm0, %v611_v3, 0.0 }
 0x798   :  { %614 = vadd.xlane.f32.xlu1 %v613_v5 }
 0x79a   :  { %v608_v6 = vpop.f32.mrf.mxu3 }
 0x79b   :  { %v609_v7 = vadd.f32 %v608_v6, %v568_v1 }
 0x79d   :  { %v612_v9 = vadd.f32 %v609_v7, %v505_v34 }
 0x79f   :  { %v616_v11 = vsel %vm117_vm0, %v612_v9, 0.0 }
 0x7a0   :  { %617 = vadd.xlane.f32.xlu2 %v616_v11 }
 0x80b   :  { %v615_v12 = vpop.xlane.xlu1 %614 }
 0x80c   :  { %v619_v13 = vmul.f32 %v615_v12, %v1785_v10 }
 0x80e   :  { %v621_v14 = vsub.f32 %v611_v3, %v619_v13 }
 0x810   :  { %v623_v15 = vmul.f32 %v621_v14, %v621_v14 }
 0x812   :  { %v625_v16 = vsel %vm117_vm0, %v623_v15, 0.0 }
 0x813   :  { %v618_v40 = vpop.xlane.xlu2 %617  ;;  %626 = vadd.xlane.f32.xlu1 %v625_v16 }
 0x814   :  { %v620_v17 = vmul.f32 %v618_v40, %v1785_v10 }
 0x816   :  { %v622_v18 = vsub.f32 %v612_v9, %v620_v17 }
 0x818   :  { %v624_v19 = vmul.f32 %v622_v18, %v622_v18 }
 0x81a   :  { %v628_v20 = vsel %vm117_vm0, %v624_v19, 0.0 }
 0x81b   :  { %629 = vadd.xlane.f32.xlu0 %v628_v20 }
 0x886   :  { %v627_v22 = vpop.xlane.xlu1 %626 }
 0x887   :  { %v631_v23 = vmul.f32 %v627_v22, %v1785_v10 }
 0x889   :  { %v633_v24 = vadd.f32 1e-12, %v631_v23 }
 0x88b   :  { %1493 = vrsqrt.f32 %v633_v24  ;;  %vm641_vm5 = vweird.f32 %v633_v24 }
 0x88e   :  { %v630_v26 = vpop.xlane.xlu0 %629 }
 0x88f   :  { %v632_v27 = vmul.f32 %v630_v26, %v1785_v10 }
 0x891   :  { %v1494_v28 = vpop.eup %1493  ;;  %v634_v29 = vadd.f32 1e-12, %v632_v27 }
 0x892   :  { %v636_v30 = vmul.f32 %v1494_v28, %v633_v24  ;;  %vm642_vm4 = vweird.f32 %v1494_v28 }
 0x893   :  { %1495 = vrsqrt.f32 %v634_v29  ;;  %vm643_vm6 = vmor %vm641_vm5, %vm642_vm4  ;;  %vm651_vm9 = vweird.f32 %v634_v29 }
 0x894   :  { %v637_v31 = vmul.f32 %v1494_v28, %v636_v30 }
 0x896   :  { %v638_v33 = vmul.f32 0.5, %v637_v31 }
 0x898   :  { %v639_v34 = vsub.f32 1.5, %v638_v33 }
 0x899   :  { %v1496_v35 = vpop.eup %1495 }
 0x89a   :  { %v640_v36 = vmul.f32 %v1494_v28, %v639_v34  ;;  %v646_v37 = vmul.f32 %v1496_v35, %v634_v29  ;;  %vm652_vm7 = vweird.f32 %v1496_v35 }
 0x89b   :  { %vm653_vm10 = vmor %vm651_vm9, %vm652_vm7 }
 0x89c   :  { %v647_v39 = vmul.f32 %v1496_v35, %v646_v37  ;;  %v644_v38 = vsel %vm643_vm6, %v1494_v28, %v640_v36 }
 0x89d   :  { %v655_v44 = vmul.f32 %v644_v38, %v621_v14 }
 0x89e   :  { %v648_v41 = vmul.f32 0.5, %v647_v39 }
 0x89f   :  { %v658_v48 = vmul.f32 %v657_v43, %v655_v44 }
 0x8a0   :  { %v649_v42 = vsub.f32 1.5, %v648_v41 }
 0x8a1   :  { %v1937_v53 = vadd.f32 %v660_v47, %v658_v48 }
 0x8a2   :  { %v650_v45 = vmul.f32 %v1496_v35, %v649_v42 }
 0x8a4   :  { %v654_v46 = vsel %vm653_vm10, %v1496_v35, %v650_v45 }
 0x8a5   :  { %v656_v49 = vmul.f32 %v654_v46, %v622_v18 }
 0x8a7   :  { %v659_v52 = vmul.f32 %v657_v43, %v656_v49 }
 0x8a9   :  { %v1939_v54 = vadd.f32 %v660_v47, %v659_v52 }
 0x8ab   :  { %v668_v55 = vpack.c.bf16 %v1939_v54, %v1937_v53 }
 0x8ad   :  { %1349 = vmatmul.msk.bf16.vlgmr.msra.gmra.mxu2 %vm117_vm0, %v668_v55 }
 0x930   :  { %v694_v56 = vpop.f32.mrf.mxu2 }
 0x931   :  { %v695_v58 = vadd.f32 %v694_v56, %v669_v57 }
 0x933   :  { %v699_v60 = vpack.c.bf16 %v695_v58, %v695_v58 }
 0x935   :  { %v703_v50 = vunpack.c.l.b16 %v699_v60 }
 0x938   :  { %v696_v59 = vpop.f32.mrf.mxu2 }
 0x939   :  { %v697_v61 = vadd.f32 %v696_v59, %v669_v57 }
 0x93b   :  { %v700_v62 = vpack.c.bf16 %v697_v61, %v697_v61 }
 0x93d   :  { %v704_v63 = vunpack.c.l.b16 %v700_v62 }
 0x93f   :  { %v705_v0 = vpack.c.b16 %v704_v63, %v703_v50 }
 0x941   :  { %706 = vrot.lane.b32.xlu0 %v705_v0, %s1700_s19  ;;  %799 = vrot.lane.b32.xlu1 %v705_v0, %s1699_s16 }
 0x942   :  { %801 = vrot.lane.b32.xlu2 %v705_v0, %s1701_s20 }
 0x99c   :  { %v802_v1 = vpop.permute.xlu2 %801 }
 0x99d   :  { %v807_v51 = vsel %vm221_vm8, %v802_v1, 0 }
 0x99e   :  { %816 = vmatpush.bf16.xpose.msra.mxu3 %v807_v51 }
 0x9b3   :  { %v707_v2 = vpop.permute.xlu0 %706  ;;  %v800_v3 = vpop.permute.xlu1 %799 }
 0x9b4   :  { %v712_v5 = vsel %vm221_vm8, %v707_v2, 0  ;;  %1352 = vmatmul.msk.bf16.vlgmr.msra.gmra.mxu3 %vm221_vm8, %v800_v3 }
 0x9b5   :  { %721 = vmatpush.bf16.xpose.msra.mxu0 %v712_v5 }
 0x9bc   :  { %1350 = vmatmul.msk.bf16.vlgmr.msra.gmra.mxu0 %vm221_vm8, %v705_v0 }
 0xa37   :  { %v818_v6 = vpop.f32.mrf.mxu3 }
 0xa38   :  { %v819_v7 = vadd.f32 %v818_v6, %v1824_v4 }
 0xa39   :  { %v723_v9 = vpop.f32.mrf.mxu0 }
 0xa3a   :  { %v724_v11 = vadd.f32 %v723_v9, %v1824_v4  ;;  %v823_v12 = vsel %vm221_vm8, %v819_v7, -inf }
 0xa3b   :  { %824 = vmax.xlane.f32.xlu0 %v823_v12 }
 0xa3c   :  { %v728_v13 = vsel %vm221_vm8, %v724_v11, -inf }
 0xa3d   :  { %729 = vmax.xlane.f32.xlu1 %v728_v13 }
 0xa3f   :  { %v820_v14 = vpop.f32.mrf.mxu3 }
 0xa40   :  { %v821_v15 = vadd.f32 %v820_v14, %v1828_v8 }
 0xa41   :  { %v725_v16 = vpop.f32.mrf.mxu0 }
 0xa42   :  { %v726_v40 = vadd.f32 %v725_v16, %v1828_v8  ;;  %v826_v17 = vsel %vm221_vm8, %v821_v15, -inf }
 0xa43   :  { %827 = vmax.xlane.f32.xlu2 %v826_v17 }
 0xa44   :  { %v731_v18 = vsel %vm221_vm8, %v726_v40, -inf }
 0xa45   :  { %732 = vmax.xlane.f32.xlu0 %v731_v18 }
 0xa59   :  { %872 = vrot.lane.b32.xlu0 %v705_v0, %s1702_s1 }
 0xaae   :  { %v825_v4 = vpop.xlane.xlu0 %824 }
 0xaaf   :  { %v829_v19 = vsub.f32 %v819_v7, %v825_v4 }
 0xab0   :  { %v730_v20 = vpop.xlane.xlu1 %729 }
 0xab1   :  { %v831_v21 = vmul.f32 1.442695, %v829_v19  ;;  %v734_v22 = vsub.f32 %v724_v11, %v730_v20 }
 0xab3   :  { %1497 = vpow2.f32 %v831_v21  ;;  %v736_v23 = vmul.f32 1.442695, %v734_v22 }
 0xab5   :  { %1499 = vpow2.f32 %v736_v23 }
 0xab6   :  { %v828_v24 = vpop.xlane.xlu2 %827 }
 0xab7   :  { %v830_v25 = vsub.f32 %v821_v15, %v828_v24 }
 0xab8   :  { %v733_v26 = vpop.xlane.xlu0 %732 }
 0xab9   :  { %v1961_v27 = vpop.eup %1497  ;;  %v833_v8 = vmul.f32 1.442695, %v830_v25  ;;  %v735_v28 = vsub.f32 %v726_v40, %v733_v26 }
 0xaba   :  { %v835_v29 = vsel %vm221_vm8, %v1961_v27, 0.0 }
 0xabb   :  { %1501 = vpow2.f32 %v833_v8  ;;  %836 = vadd.xlane.f32.xlu2 %v835_v29  ;;  %v738_v30 = vmul.f32 1.442695, %v735_v28  ;;  %v1965_v31 = vpop.eup %1499 }
 0xabc   :  { %v740_v35 = vsel %vm221_vm8, %v1965_v31, 0.0 }
 0xabd   :  { %1503 = vpow2.f32 %v738_v30 }
 0xac1   :  { %v1502_v33 = vpop.eup %1501 }
 0xac2   :  { %v838_v34 = vsel %vm221_vm8, %v1502_v33, 0.0 }
 0xac3   :  { %839 = vadd.xlane.f32.xlu1 %v838_v34  ;;  %741 = vadd.xlane.f32.xlu2 %v740_v35  ;;  %v1970_v36 = vpop.eup %1503  ;;  %v1435_v35 = vld [vmem:[%s2048_s4 + $0x10] sm:$0xff] }
 0xac4   :  { %v743_v37 = vsel %vm221_vm8, %v1970_v36, 0.0 }
 0xacb   :  { %744 = vadd.xlane.f32.xlu1 %v743_v37  ;;  %v873_v39 = vpop.permute.xlu0 %872 }
 0xacc   :  { %885 = vmatpush.bf16.msrb.mxu2 %v873_v39 }
 0xadb   :  { %777 = vrot.lane.b32.xlu2 %v705_v0, %s1693_s21 }
 0xb2e   :  { %v837_v38 = vpop.xlane.xlu2 %836 }
 0xb2f   :  { %1505 = vrcp.f32 %v837_v38  ;;  %v852_v57 = vand.u32 2147483648, %v837_v38  ;;  %vm846_vm13 = vweird.f32 %v837_v38  ;;  %v850_v59 = vand.u32 2147483647, %v837_v38 }
 0xb31   :  { %v853_v1 = vor.u32 1.1754944e-38, %v852_v57  ;;  %vm851_vm1 = vcmp.eq.f32.partialorder %v850_v59, 8.507059e+37 }
 0xb35   :  { %v1506_v41 = vpop.eup %1505 }
 0xb36   :  { %v842_v42 = vmul.f32 %v1506_v41, %v837_v38  ;;  %v840_v43 = vpop.xlane.xlu1 %839  ;;  %v742_v44 = vpop.xlane.xlu2 %741  ;;  %vm847_vm12 = vweird.f32 %v1506_v41 }
 0xb37   :  { %1507 = vrcp.f32 %v840_v43  ;;  %vm848_vm14 = vmor %vm846_vm13, %vm847_vm12  ;;  %v865_v61 = vand.u32 2147483647, %v840_v43  ;;  %v867_v62 = vand.u32 2147483648, %v840_v43  ;;  %vm861_vm2 = vweird.f32 %v840_v43 }
 0xb38   :  { %v843_v45 = vsub.f32 1.0, %v842_v42  ;;  %1509 = vrcp.f32 %v742_v44  ;;  %vm751_vm7 = vweird.f32 %v742_v44  ;;  %v757_v13 = vand.u32 2147483648, %v742_v44 }
 0xb39   :  { %vm866_vm5 = vcmp.eq.f32.partialorder %v865_v61, 8.507059e+37  ;;  %v868_v6 = vor.u32 1.1754944e-38, %v867_v62  ;;  %v755_v16 = vand.u32 2147483647, %v742_v44  ;;  %v910_v42 = vperm.slane %v1933_v32, 3 }
 0xb3a   :  { %v844_v46 = vmul.f32 %v1506_v41, %v843_v45  ;;  %v758_v21 = vor.u32 1.1754944e-38, %v757_v13 }
 0xb3b   :  { %vm756_vm12 = vcmp.eq.f32.partialorder %v755_v16, 8.507059e+37 }
 0xb3c   :  { %v845_v49 = vadd.f32 %v1506_v41, %v844_v46 }
 0xb3d   :  { %v1508_v47 = vpop.eup %1507 }
 0xb3e   :  { %v1510_v48 = vpop.eup %1509  ;;  %v857_v52 = vmul.f32 %v1508_v47, %v840_v43  ;;  %v778_v55 = vpop.permute.xlu2 %777  ;;  %v849_v63 = vsel %vm848_vm14, %v1506_v41, %v845_v49  ;;  %vm862_vm15 = vweird.f32 %v1508_v47 }
 0xb3f   :  { %v745_v56 = vpop.xlane.xlu1 %744  ;;  %v747_v58 = vmul.f32 %v1510_v48, %v742_v44  ;;  %790 = vmatpush.bf16.msra.mxu1 %v778_v55  ;;  %v854_v5 = vsel %vm851_vm1, %v853_v1, %v849_v63  ;;  %vm863_vm4 = vmor %vm861_vm2, %vm862_vm15  ;;  %vm752_vm6 = vweird.f32 %v1510_v48  ;;  %v1438_v63 = vld [vmem:[%s2049_s5 + $0x18] sm:$0xff] }
 0xb40   :  { %1511 = vrcp.f32 %v745_v56  ;;  %v858_v60 = vsub.f32 1.0, %v857_v52  ;;  %v855_v14 = vmul.f32 %v1961_v27, %v854_v5  ;;  %vm753_vm9 = vmor %vm751_vm7, %vm752_vm6  ;;  %v770_v17 = vand.u32 2147483647, %v745_v56 }
 0xb41   :  { %v748_v50 = vsub.f32 1.0, %v747_v58  ;;  %v772_v18 = vand.u32 2147483648, %v745_v56  ;;  %vm766_vm13 = vweird.f32 %v745_v56 }
 0xb42   :  { %v859_v0 = vmul.f32 %v1508_v47, %v858_v60  ;;  %vm771_vm15 = vcmp.eq.f32.partialorder %v770_v17, 8.507059e+37 }
 0xb43   :  { %v749_v51 = vmul.f32 %v1510_v48, %v748_v50  ;;  %v773_v24 = vor.u32 1.1754944e-38, %v772_v18  ;;  %1020 = vmatpush.bf16.msrb.mxu1 %v1438_v63 }
 0xb44   :  { %v860_v2 = vadd.f32 %v1508_v47, %v859_v0 }
 0xb45   :  { %v750_v9 = vadd.f32 %v1510_v48, %v749_v51  ;;  %v1437_v51 = vld [vmem:[%s2049_s5 + $0x10] sm:$0xff] }
 0xb46   :  { %v1512_v3 = vpop.eup %1511  ;;  %v864_v7 = vsel %vm863_vm4, %v1508_v47, %v860_v2 }
 0xb47   :  { %v762_v11 = vmul.f32 %v1512_v3, %v745_v56  ;;  %v869_v12 = vsel %vm866_vm5, %v868_v6, %v864_v7  ;;  %v754_v4 = vsel %vm753_vm9, %v1510_v48, %v750_v9  ;;  %vm767_vm10 = vweird.f32 %v1512_v3  ;;  %1021 = vmatpush.bf16.msrb.mxu1 %v1437_v51 }
 0xb48   :  { %v870_v15 = vmul.f32 %v1502_v33, %v869_v12  ;;  %v759_v23 = vsel %vm756_vm12, %v758_v21, %v754_v4  ;;  %vm768_vm14 = vmor %vm766_vm13, %vm767_vm10  ;;  %v986_v4 = vperm.slane %v1933_v32, 4 }
 0xb49   :  { %v763_v40 = vsub.f32 1.0, %v762_v11  ;;  %v760_v27 = vmul.f32 %v1965_v31, %v759_v23  ;;  %v1436_v31 = vld [vmem:[%s2048_s4 + $0x18] sm:$0xff] }
 0xb4a   :  { %v871_v20 = vpack.c.bf16 %v870_v15, %v855_v14  ;;  %932 = vmatpush.bf16.msrb.mxu0 %v1436_v31 }
 0xb4b   :  { %v764_v19 = vmul.f32 %v1512_v3, %v763_v40 }
 0xb4c   :  { %1353 = vmatmul.msk.bf16.vlgmr.msrb.gmra.mxu2 %vm221_vm8, %v871_v20 }
 0xb4d   :  { %v765_v22 = vadd.f32 %v1512_v3, %v764_v19 }
 0xb4e   :  { %933 = vmatpush.bf16.msrb.mxu0 %v1435_v35 }
 0xb4f   :  { %v769_v25 = vsel %vm768_vm14, %v1512_v3, %v765_v22  ;;  %v989_v22 = vperm.slane %v1933_v32, 5 }
 0xb50   :  { %v774_v26 = vsel %vm771_vm15, %v773_v24, %v769_v25 }
 0xb51   :  { %v775_v8 = vmul.f32 %v1970_v36, %v774_v26 }
 0xb53   :  { %v776_v28 = vpack.c.bf16 %v775_v8, %v760_v27 }
 0xb55   :  { %1351 = vmatmul.msk.bf16.vlgmr.msra.gmra.mxu1 %vm221_vm8, %v776_v28  ;;  %v1442_v28 = vld [vmem:[%s2050_s6 + $0x38] sm:$0xff] }
 0xb56   :  { %1088 = vmatpush.bf16.msrb.mxu3 %v1442_v28 }
 0xbcf   :  { %v887_v29 = vpop.f32.mrf.mxu2 }
 0xbd0   :  { %894 = vrot.lane.b32.xlu1 %v887_v29, %s1703_s22  ;;  %v1441_v29 = vld [vmem:[%s2050_s6 + $0x30] sm:$0xff] }
 0xbd1   :  { %1089 = vmatpush.bf16.msrb.mxu3 %v1441_v29  ;;  %v114_v29 = vld [vmem:[#allocation8 + $0x10] sm:$0xf] }
 0xbd2   :  { %v792_v30 = vpop.f32.mrf.mxu1 }
 0xbd3   :  { %797 = vst.msk [vmem:[#allocation2] sm:$0xff] %vm221_vm8, %v792_v30  ;;  %v1440_v30 = vld [vmem:[%s2050_s6 + $0x28] sm:$0xff] }
 0xbd5   :  { %1090 = vmatpush.bf16.msrb.mxu3 %v1440_v30 }
 0xbd7   :  { %v889_v33 = vpop.f32.mrf.mxu2 }
 0xbd8   :  { %896 = vrot.lane.b32.xlu0 %v889_v33, %s1703_s22  ;;  %v998_v33 = vperm.slane %v1933_v32, 6 }
 0xbda   :  { %v794_v34 = vpop.f32.mrf.mxu1 }
 0xbdb   :  { %798 = vst.msk [vmem:[#allocation2 + $0x8] sm:$0xff] %vm221_vm8, %v794_v34  ;;  %v1439_v34 = vld [vmem:[%s2050_s6 + $0x20] sm:$0xff]  ;;  %s1704_s6 = smov [#allocation12]  }
 0xbdc   :  { %1091 = vmatpush.bf16.msrb.mxu3 %v1439_v34  ;;  %s1272_s10 = sshll.u32 %s1704_s6, 4  ;;  %s1273_s10 = int_to_ptr.vmem [resolvable:$true] %s1272_s10 }
 0xc42   :  { %v895_v36 = vpop.permute.xlu1 %894 }
 0xc43   :  { %900 = vst.msk [vmem:[#allocation2] sm:$0xff] %vm414_vm11, %v895_v36 }
 0xc4a   :  { %v897_v37 = vpop.permute.xlu0 %896  ;;  %v902_v39 = vld [vmem:[#allocation2] sm:$0xff] }
 0xc4b   :  { %901 = vst.msk [vmem:[#allocation2 + $0x8] sm:$0xff] %vm414_vm11, %v897_v37 }
 0xc52   :  { %v903_v38 = vld [vmem:[#allocation2 + $0x8] sm:$0xff] }
 0xc53   :  { %v909_v41 = vpack.c.bf16 %v903_v38, %v902_v39 }
 0xc55   :  { %1366 = vmatmul.msk.bf16.vlgmr.msrb.gmra.mxu0 %vm117_vm0, %v909_v41 }
 0xcd2   :  { %v935_v43 = vpop.f32.mrf.mxu0 }
 0xcd3   :  { %v936_v44 = vadd.f32 %v935_v43, %v910_v42 }
 0xcd5   :  { %v940_v45 = vadd.f32 %v936_v44, %v1937_v53 }
 0xcd7   :  { %v942_v46 = vsel %vm117_vm0, %v940_v45, 0.0 }
 0xcd8   :  { %943 = vadd.xlane.f32.xlu0 %v942_v46 }
 0xcda   :  { %v937_v47 = vpop.f32.mrf.mxu0 }
 0xcdb   :  { %v938_v48 = vadd.f32 %v937_v47, %v910_v42 }
 0xcdd   :  { %v941_v49 = vadd.f32 %v938_v48, %v1939_v54 }
 0xcdf   :  { %v945_v52 = vsel %vm117_vm0, %v941_v49, 0.0 }
 0xce0   :  { %946 = vadd.xlane.f32.xlu2 %v945_v52 }
 0xd4b   :  { %v944_v55 = vpop.xlane.xlu0 %943 }
 0xd4c   :  { %v948_v56 = vmul.f32 %v944_v55, %v1785_v10 }
 0xd4e   :  { %v950_v57 = vsub.f32 %v940_v45, %v948_v56 }
 0xd50   :  { %v952_v58 = vmul.f32 %v950_v57, %v950_v57 }
 0xd52   :  { %v954_v59 = vsel %vm117_vm0, %v952_v58, 0.0 }
 0xd53   :  { %v947_v60 = vpop.xlane.xlu2 %946  ;;  %955 = vadd.xlane.f32.xlu1 %v954_v59 }
 0xd54   :  { %v949_v53 = vmul.f32 %v947_v60, %v1785_v10 }
 0xd56   :  { %v951_v61 = vsub.f32 %v941_v49, %v949_v53 }
 0xd58   :  { %v953_v62 = vmul.f32 %v951_v61, %v951_v61 }
 0xd5a   :  { %v957_v50 = vsel %vm117_vm0, %v953_v62, 0.0 }
 0xd5b   :  { %958 = vadd.xlane.f32.xlu0 %v957_v50 }
 0xdc6   :  { %v956_v54 = vpop.xlane.xlu1 %955 }
 0xdc7   :  { %v960_v0 = vmul.f32 %v956_v54, %v1785_v10 }
 0xdc9   :  { %v962_v1 = vadd.f32 1e-12, %v960_v0 }
 0xdcb   :  { %1513 = vrsqrt.f32 %v962_v1  ;;  %vm970_vm11 = vweird.f32 %v962_v1 }
 0xdce   :  { %v959_v2 = vpop.xlane.xlu0 %958 }
 0xdcf   :  { %v961_v3 = vmul.f32 %v959_v2, %v1785_v10 }
 0xdd1   :  { %v1514_v5 = vpop.eup %1513  ;;  %v963_v6 = vadd.f32 1e-12, %v961_v3 }
 0xdd2   :  { %v965_v7 = vmul.f32 %v1514_v5, %v962_v1  ;;  %vm971_vm8 = vweird.f32 %v1514_v5 }
 0xdd3   :  { %1515 = vrsqrt.f32 %v963_v6  ;;  %vm972_vm1 = vmor %vm970_vm11, %vm971_vm8  ;;  %vm980_vm4 = vweird.f32 %v963_v6 }
 0xdd4   :  { %v966_v9 = vmul.f32 %v1514_v5, %v965_v7 }
 0xdd6   :  { %v967_v11 = vmul.f32 0.5, %v966_v9 }
 0xdd8   :  { %v968_v12 = vsub.f32 1.5, %v967_v11 }
 0xdd9   :  { %v1516_v13 = vpop.eup %1515 }
 0xdda   :  { %v969_v14 = vmul.f32 %v1514_v5, %v968_v12  ;;  %v975_v15 = vmul.f32 %v1516_v13, %v963_v6  ;;  %vm981_vm2 = vweird.f32 %v1516_v13 }
 0xddb   :  { %vm982_vm5 = vmor %vm980_vm4, %vm981_vm2 }
 0xddc   :  { %v976_v16 = vmul.f32 %v1516_v13, %v975_v15  ;;  %v973_v40 = vsel %vm972_vm1, %v1514_v5, %v969_v14 }
 0xddd   :  { %v984_v19 = vmul.f32 %v973_v40, %v950_v57 }
 0xdde   :  { %v977_v17 = vmul.f32 0.5, %v976_v16  ;;  %v1444_v16 = vld [vmem:[#allocation9 + $0x8] sm:$0xff] }
 0xddf   :  { %v987_v23 = vmul.f32 %v986_v4, %v984_v19  ;;  %1177 = vmatpush.bf16.msra.mxu2 %v1444_v16 }
 0xde0   :  { %v978_v18 = vsub.f32 1.5, %v977_v17 }
 0xde1   :  { %v990_v26 = vadd.f32 %v989_v22, %v987_v23 }
 0xde2   :  { %v979_v20 = vmul.f32 %v1516_v13, %v978_v18  ;;  %v1443_v18 = vld [vmem:[#allocation9] sm:$0xff] }
 0xde3   :  { %1178 = vmatpush.bf16.msra.mxu2 %v1443_v18 }
 0xde4   :  { %v983_v21 = vsel %vm982_vm5, %v1516_v13, %v979_v20 }
 0xde5   :  { %v985_v24 = vmul.f32 %v983_v21, %v951_v61  ;;  %v1056_v61 = vperm.slane %v1933_v32, 7 }
 0xde7   :  { %v988_v25 = vmul.f32 %v986_v4, %v985_v24 }
 0xde9   :  { %v991_v27 = vadd.f32 %v989_v22, %v988_v25 }
 0xdeb   :  { %v997_v8 = vpack.c.bf16 %v991_v27, %v990_v26 }
 0xded   :  { %1379 = vmatmul.msk.bf16.vlgmr.msrb.gmra.mxu1 %vm117_vm0, %v997_v8 }
 0xe6a   :  { %v1023_v31 = vpop.f32.mrf.mxu1 }
 0xe6b   :  { %v1024_v35 = vadd.f32 %v1023_v31, %v998_v33 }
 0xe6d   :  { %v1030_v36 = vmul.f32 0.044715, %v1024_v35  ;;  %v1028_v56 = vmul.f32 0.5, %v1024_v35 }
 0xe6f   :  { %v1032_v37 = vmul.f32 %v1030_v36, %v1024_v35 }
 0xe71   :  { %v1034_v39 = vmul.f32 %v1032_v37, %v1024_v35  ;;  %v1147_v37 = vperm.slane %v114_v29, 1 }
 0xe72   :  { %v1025_v38 = vpop.f32.mrf.mxu1 }
 0xe73   :  { %v1036_v41 = vadd.f32 %v1034_v39, %v1024_v35  ;;  %v1026_v42 = vadd.f32 %v1025_v38, %v998_v33 }
 0xe75   :  { %v1031_v43 = vmul.f32 0.044715, %v1026_v42  ;;  %v1038_v44 = vmul.f32 0.7978846, %v1036_v41  ;;  %v1029_v57 = vmul.f32 0.5, %v1026_v42 }
 0xe77   :  { %v1033_v45 = vmul.f32 %v1031_v43, %v1026_v42  ;;  %1517 = vtanh.f32 %v1038_v44 }
 0xe79   :  { %v1035_v46 = vmul.f32 %v1033_v45, %v1026_v42  ;;  %v1446_v45 = vld [vmem:[#allocation11 + $0x8] sm:$0xff] }
 0xe7a   :  { %1214 = vmatpush.bf16.msra.mxu0 %v1446_v45 }
 0xe7b   :  { %v1037_v47 = vadd.f32 %v1035_v46, %v1026_v42  ;;  %v1445_v46 = vld [vmem:[#allocation11] sm:$0xff] }
 0xe7d   :  { %v1039_v48 = vmul.f32 0.7978846, %v1037_v47  ;;  %v1518_v49 = vpop.eup %1517 }
 0xe7e   :  { %v1042_v52 = vadd.f32 1.0, %v1518_v49  ;;  %1215 = vmatpush.bf16.msra.mxu0 %v1445_v46 }
 0xe7f   :  { %1519 = vtanh.f32 %v1039_v48  ;;  %v1155_v48 = vperm.slane %v114_v29, 2 }
 0xe80   :  { %v1044_v59 = vmul.f32 %v1042_v52, %v1028_v56 }
 0xe85   :  { %v1520_v55 = vpop.eup %1519 }
 0xe86   :  { %v1043_v58 = vadd.f32 1.0, %v1520_v55 }
 0xe88   :  { %v1045_v60 = vmul.f32 %v1043_v58, %v1029_v57 }
 0xe8a   :  { %v1055_v53 = vpack.c.bf16 %v1045_v60, %v1044_v59  ;;  %v1192_v59 = vperm.slane %v114_v29, 3 }
 0xe8c   :  { %1404 = vmatmul.msk.bf16.vlgmr.msrb.gmra.mxu3 %vm593_vm3, %v1055_v53 }
 0xf0f   :  { %v1093_v62 = vpop.f32.mrf.mxu3 }
 0xf10   :  { %v1094_v50 = vadd.f32 %v1093_v62, %v1056_v61 }
 0xf12   :  { %v1098_v54 = vadd.f32 %v1094_v50, %v990_v26 }
 0xf14   :  { %v1100_v63 = vsel %vm117_vm0, %v1098_v54, 0.0 }
 0xf15   :  { %1101 = vadd.xlane.f32.xlu2 %v1100_v63 }
 0xf17   :  { %v1095_v0 = vpop.f32.mrf.mxu3 }
 0xf18   :  { %v1096_v1 = vadd.f32 %v1095_v0, %v1056_v61 }
 0xf1a   :  { %v1099_v51 = vadd.f32 %v1096_v1, %v991_v27 }
 0xf1c   :  { %v1103_v2 = vsel %vm117_vm0, %v1099_v51, 0.0 }
 0xf1d   :  { %1104 = vadd.xlane.f32.xlu0 %v1103_v2 }
 0xf88   :  { %v1102_v3 = vpop.xlane.xlu2 %1101 }
 0xf89   :  { %v1106_v5 = vmul.f32 %v1102_v3, %v1785_v10 }
 0xf8b   :  { %v1108_v6 = vsub.f32 %v1098_v54, %v1106_v5 }
 0xf8d   :  { %v1110_v7 = vmul.f32 %v1108_v6, %v1108_v6 }
 0xf8f   :  { %v1112_v9 = vsel %vm117_vm0, %v1110_v7, 0.0 }
 0xf90   :  { %v1105_v32 = vpop.xlane.xlu0 %1104  ;;  %1113 = vadd.xlane.f32.xlu1 %v1112_v9 }
 0xf91   :  { %v1107_v11 = vmul.f32 %v1105_v32, %v1785_v10 }
 0xf93   :  { %v1109_v12 = vsub.f32 %v1099_v51, %v1107_v11 }
 0xf95   :  { %v1111_v13 = vmul.f32 %v1109_v12, %v1109_v12 }
 0xf97   :  { %v1115_v14 = vsel %vm117_vm0, %v1111_v13, 0.0 }
 0xf98   :  { %1116 = vadd.xlane.f32.xlu2 %v1115_v14 }
0x1003   :  { %v1114_v15 = vpop.xlane.xlu1 %1113 }
0x1004   :  { %v1118_v40 = vmul.f32 %v1114_v15, %v1785_v10 }
0x1006   :  { %v1120_v17 = vadd.f32 1e-12, %v1118_v40 }
0x1008   :  { %1521 = vrsqrt.f32 %v1120_v17  ;;  %vm1128_vm6 = vweird.f32 %v1120_v17 }
0x100b   :  { %v1117_v4 = vpop.xlane.xlu2 %1116 }
0x100c   :  { %v1119_v19 = vmul.f32 %v1117_v4, %v1785_v10  ;;  %v1144_v10 = vperm.slane %v114_v29, 0 }
0x100e   :  { %v1522_v20 = vpop.eup %1521  ;;  %v1121_v21 = vadd.f32 1e-12, %v1119_v19 }
0x100f   :  { %v1123_v22 = vmul.f32 %v1522_v20, %v1120_v17  ;;  %vm1129_vm3 = vweird.f32 %v1522_v20 }
0x1010   :  { %1523 = vrsqrt.f32 %v1121_v21  ;;  %vm1130_vm7 = vmor %vm1128_vm6, %vm1129_vm3  ;;  %vm1138_vm10 = vweird.f32 %v1121_v21 }
0x1011   :  { %v1124_v23 = vmul.f32 %v1522_v20, %v1123_v22 }
0x1013   :  { %v1125_v24 = vmul.f32 0.5, %v1124_v23 }
0x1015   :  { %v1126_v25 = vsub.f32 1.5, %v1125_v24 }
0x1016   :  { %v1524_v26 = vpop.eup %1523 }
0x1017   :  { %v1127_v27 = vmul.f32 %v1522_v20, %v1126_v25  ;;  %v1133_v8 = vmul.f32 %v1524_v26, %v1121_v21  ;;  %vm1139_vm9 = vweird.f32 %v1524_v26 }
0x1018   :  { %vm1140_vm12 = vmor %vm1138_vm10, %vm1139_vm9 }
0x1019   :  { %v1134_v28 = vmul.f32 %v1524_v26, %v1133_v8  ;;  %v1131_v30 = vsel %vm1130_vm7, %v1522_v20, %v1127_v27 }
0x101a   :  { %v1142_v31 = vmul.f32 %v1131_v30, %v1108_v6 }
0x101b   :  { %v1135_v33 = vmul.f32 0.5, %v1134_v28 }
0x101c   :  { %v1145_v39 = vmul.f32 %v1144_v10, %v1142_v31 }
0x101d   :  { %v1136_v34 = vsub.f32 1.5, %v1135_v33 }
0x101e   :  { %v1148_v42 = vadd.f32 %v1147_v37, %v1145_v39 }
0x101f   :  { %v1137_v35 = vmul.f32 %v1524_v26, %v1136_v34 }
0x1021   :  { %v1141_v36 = vsel %vm1140_vm12, %v1524_v26, %v1137_v35 }
0x1022   :  { %v1143_v38 = vmul.f32 %v1141_v36, %v1109_v12 }
0x1024   :  { %v1146_v41 = vmul.f32 %v1144_v10, %v1143_v38 }
0x1026   :  { %v1149_v43 = vadd.f32 %v1147_v37, %v1146_v41 }
0x1028   :  { %v1154_v44 = vpack.c.bf16 %v1149_v43, %v1148_v42 }
0x102a   :  { %1413 = vmatmul.msk.bf16.vlgmr.msra.gmra.mxu2 %vm117_vm0, %v1154_v44 }
0x10ad   :  { %v1180_v47 = vpop.f32.mrf.mxu2 }
0x10ae   :  { %v1181_v49 = vadd.f32 %v1180_v47, %v1155_v48 }
0x10b0   :  { %1525 = vtanh.f32 %v1181_v49 }
0x10b5   :  { %v1182_v52 = vpop.f32.mrf.mxu2 }
0x10b6   :  { %v1183_v55 = vadd.f32 %v1182_v52, %v1155_v48  ;;  %v1526_v56 = vpop.eup %1525 }
0x10b8   :  { %1527 = vtanh.f32 %v1183_v55 }
0x10be   :  { %v1528_v57 = vpop.eup %1527 }
0x10bf   :  { %v1191_v58 = vpack.c.bf16 %v1528_v57, %v1526_v56 }
0x10c1   :  { %1422 = vmatmul.msk.bf16.vlgmr.msra.gmra.mxu0 %vm117_vm0, %v1191_v58 }
0x113e   :  { %v1217_v60 = vpop.f32.mrf.mxu0 }
0x113f   :  { %v1218_v53 = vadd.f32 %v1217_v60, %v1192_v59 }
0x1141   :  { %1222 = vmax.xlane.f32.xlu0 %v1218_v53 }
0x1146   :  { %v1219_v61 = vpop.f32.mrf.mxu0 }
0x1147   :  { %v1220_v62 = vadd.f32 %v1219_v61, %v1192_v59 }
0x1149   :  { %1224 = vmax.xlane.f32.xlu1 %v1220_v62 }
0x11b4   :  { %v1223_v50 = vpop.xlane.xlu0 %1222 }
0x11b5   :  { %v1226_v54 = vsub.f32 %v1218_v53, %v1223_v50 }
0x11b7   :  { %v1228_v63 = vmul.f32 1.442695, %v1226_v54 }
0x11b9   :  { %1529 = vpow2.f32 %v1228_v63 }
0x11bc   :  { %v1225_v0 = vpop.xlane.xlu1 %1224 }
0x11bd   :  { %v1227_v1 = vsub.f32 %v1220_v62, %v1225_v0 }
0x11bf   :  { %v1530_v51 = vpop.eup %1529  ;;  %v1230_v2 = vmul.f32 1.442695, %v1227_v1 }
0x11c0   :  { %1232 = vadd.xlane.f32.xlu2 %v1530_v51 }
0x11c1   :  { %1531 = vpow2.f32 %v1230_v2 }
0x11c7   :  { %v1532_v3 = vpop.eup %1531 }
0x11c8   :  { %1234 = vadd.xlane.f32.xlu0 %v1532_v3 }
0x1233   :  { %v1233_v5 = vpop.xlane.xlu2 %1232 }
0x1234   :  { %1533 = vrcp.f32 %v1233_v5  ;;  %v1247_v11 = vand.u32 2147483648, %v1233_v5  ;;  %v1245_v13 = vand.u32 2147483647, %v1233_v5  ;;  %vm1241_vm13 = vweird.f32 %v1233_v5 }
0x1236   :  { %v1248_v16 = vor.u32 1.1754944e-38, %v1247_v11  ;;  %vm1246_vm15 = vcmp.eq.f32.partialorder %v1245_v13, 8.507059e+37 }
0x123a   :  { %v1534_v6 = vpop.eup %1533 }
0x123b   :  { %v1237_v7 = vmul.f32 %v1534_v6, %v1233_v5  ;;  %v1235_v9 = vpop.xlane.xlu0 %1234  ;;  %vm1242_vm0 = vweird.f32 %v1534_v6 }
0x123c   :  { %1535 = vrcp.f32 %v1235_v9  ;;  %vm1243_vm14 = vmor %vm1241_vm13, %vm1242_vm0  ;;  %v1262_v20 = vand.u32 2147483648, %v1235_v9  ;;  %v1260_v22 = vand.u32 2147483647, %v1235_v9  ;;  %vm1256_vm11 = vweird.f32 %v1235_v9 }
0x123d   :  { %v1238_v32 = vsub.f32 1.0, %v1237_v7 }
0x123e   :  { %v1263_v24 = vor.u32 1.1754944e-38, %v1262_v20  ;;  %vm1261_vm2 = vcmp.eq.f32.partialorder %v1260_v22, 8.507059e+37 }
0x123f   :  { %v1239_v12 = vmul.f32 %v1534_v6, %v1238_v32 }
0x1241   :  { %v1240_v14 = vadd.f32 %v1534_v6, %v1239_v12 }
0x1242   :  { %v1536_v15 = vpop.eup %1535 }
0x1243   :  { %v1244_v40 = vsel %vm1243_vm14, %v1534_v6, %v1240_v14  ;;  %v1252_v17 = vmul.f32 %v1536_v15, %v1235_v9  ;;  %vm1257_vm8 = vweird.f32 %v1536_v15 }
0x1244   :  { %v1249_v18 = vsel %vm1246_vm15, %v1248_v16, %v1244_v40  ;;  %vm1258_vm1 = vmor %vm1256_vm11, %vm1257_vm8 }
0x1245   :  { %v1253_v4 = vsub.f32 1.0, %v1252_v17  ;;  %v1250_v19 = vmul.f32 %v1530_v51, %v1249_v18 }
0x1247   :  { %v1254_v21 = vmul.f32 %v1536_v15, %v1253_v4  ;;  %1266 = vst [vmem:[#allocation12] sm:$0xff] %v1250_v19 }
0x1249   :  { %v1255_v23 = vadd.f32 %v1536_v15, %v1254_v21 }
0x124b   :  { %v1259_v25 = vsel %vm1258_vm1, %v1536_v15, %v1255_v23 }
0x124c   :  { %v1264_v26 = vsel %vm1261_vm2, %v1263_v24, %v1259_v25 }
0x124d   :  { %v1265_v27 = vmul.f32 %v1532_v3, %v1264_v26 }
0x124f   :  { %1267 = vst [vmem:[#allocation12 + $0x8] sm:$0xff] %v1265_v27 }
0x1250   :  { %1280 = dma.vmem_to_hbm [thread:$0]  %s1273_s10, 256, %s1275_s0, [#allocation5], %s1690_s17, %s1690_s17, %s1691_s18  }
0x1251   :  { %1687 = dma.done.wait [#allocation5], 256  }
0x1252   :  { %1688 = vsyncadd [#allocation5], 4294967040 }
0x1253   :  { %1285 = vsyncpa [#allocation4], 1 }
0x1254   :  { %1286 = vsyncpa [#allocation7], 1 }
0x1255   :  { %1287 = vsyncpa [#allocation10], 1 }
0x1256   :  { %1288 = vsyncpa [#allocation5], 1 }

</bundles_post_ra>
